<compile_context>
chip_gen: v6e
topology: v6e:2x2x1
jax: 0.10.0
libtpu: 0.0.40
codegen_flags: <defaults>
</compile_context>

<pallas_src>
import jax
import jax.numpy as jnp
from jax import lax
from jax.experimental import pallas as pl
from jax.experimental.pallas import tpu as pltpu

BLOCK_SIZE = 128      # causal-mask extent (module's `block_size`)
N_EMBD = 256          # module's `n_embd`
HEAD_SIZE = 64        # head_size passed to Head(head_size)
DROPOUT_P = 0.2       # module's `dropout`

_KEEP_THR = int(DROPOUT_P * (1 << 31))      # raw 31-bit threshold: P(keep)=1-p
_KEEP_SCALE = 1.0 / (1.0 - DROPOUT_P)


def _mix32(x):
    """Cheap stateless 32-bit mixer (lowbias32) on uint32 lanes."""
    x = x ^ (x >> 16)
    x = x * jnp.uint32(0x7FEB352D)
    x = x ^ (x >> 15)
    x = x * jnp.uint32(0x846CA68B)
    x = x ^ (x >> 16)
    return x


def _dropout_keep_mask(seed, batch_idx, num_batches, T):
    """Deterministic Bernoulli(1-p) keep-mask for one (T, T) attention tile."""
    row = lax.broadcasted_iota(jnp.int32, (T, T), 0)
    col = lax.broadcasted_iota(jnp.int32, (T, T), 1)
    ctr = (seed * num_batches + batch_idx) * (T * T) + row * T + col
    bits = _mix32(ctr.astype(jnp.uint32))
    r31 = (bits >> 1).astype(jnp.int32)          # non-negative 31-bit value
    return r31 >= _KEEP_THR, row, col


def _head_kernel(seed_ref,                       # scalar prefetch (SMEM)
                 x_ref, wk_ref, wq_ref, wv_ref,  # inputs (VMEM)
                 o_ref):                         # output (VMEM)
    b = pl.program_id(0)
    xb = x_ref[0]                                # (T, C) float32
    T, C = xb.shape

    # ---- projections (MXU, f32 accumulation) ----
    k = jnp.dot(xb, wk_ref[...], preferred_element_type=jnp.float32)   # (T, H)
    q = jnp.dot(xb, wq_ref[...], preferred_element_type=jnp.float32)   # (T, H)
    v = jnp.dot(xb, wv_ref[...], preferred_element_type=jnp.float32)   # (T, H)

    # ---- scaled scores + causal mask (module scales by C**-0.5, C = n_embd) ----
    scale = float(C) ** -0.5
    wei = jnp.dot(q, k.T, preferred_element_type=jnp.float32) * scale  # (T, T)

    keep, row, col = _dropout_keep_mask(seed_ref[0], b, pl.num_programs(0), T)
    wei = jnp.where(col <= row, wei, -jnp.inf)

    # ---- softmax over keys (numerically stable) ----
    m = jnp.max(wei, axis=-1, keepdims=True)
    p = jnp.exp(wei - m)
    l = jnp.sum(p, axis=-1, keepdims=True)
    wei = p / l

    # ---- Dropout(p=0.2) on attention weights (inverted scaling) ----
    wei = jnp.where(keep, wei * _KEEP_SCALE, 0.0)

    # ---- weighted sum of values ----
    out = jnp.dot(wei, v, preferred_element_type=jnp.float32)          # (T, H)
    o_ref[...] = out[None].astype(o_ref.dtype)


@jax.jit
def head_forward(x, wk, wq, wv, seed):
    """x: (B, T, C) f32; wk/wq/wv: (C, H) f32; seed: (1,) int32 -> (B, T, H)."""
    B, T, C = x.shape
    H = wk.shape[1]
    assert T <= BLOCK_SIZE and T % 8 == 0, "T must be <= block_size, mult of 8"
    assert C % 128 == 0, "n_embd must be lane-aligned"

    return pl.pallas_call(
        _head_kernel,
        out_shape=jax.ShapeDtypeStruct((B, T, H), x.dtype),
        grid_spec=pltpu.PrefetchScalarGridSpec(
            num_scalar_prefetch=1,
            grid=(B,),
            in_specs=[
                pl.BlockSpec((1, T, C), lambda b, seed: (b, 0, 0)),   # x slab
                pl.BlockSpec((C, H), lambda b, seed: (0, 0)),         # Wk (resident)
                pl.BlockSpec((C, H), lambda b, seed: (0, 0)),         # Wq (resident)
                pl.BlockSpec((C, H), lambda b, seed: (0, 0)),         # Wv (resident)
            ],
            out_specs=pl.BlockSpec((1, T, H), lambda b, seed: (b, 0, 0)),
        ),
        compiler_params=pltpu.CompilerParams(
            dimension_semantics=("parallel",)),
    )(seed, x, wk, wq, wv)


def _reference(x, wk, wq, wv, seed):
    """Pure-JAX reference (same deterministic dropout mask as the kernel)."""
    B, T, C = x.shape
    k = x @ wk
    q = x @ wq
    v = x @ wv
    wei = jnp.einsum("bth,bsh->bts", q, k) * (float(C) ** -0.5)
    row = lax.broadcasted_iota(jnp.int32, (T, T), 0)
    col = lax.broadcasted_iota(jnp.int32, (T, T), 1)
    wei = jnp.where(col <= row, wei, -jnp.inf)
    wei = jax.nn.softmax(wei, axis=-1)
    b_idx = jnp.arange(B, dtype=jnp.int32)[:, None, None]
    ctr = (seed[0] * B + b_idx) * (T * T) + row * T + col
    bits = _mix32(ctr.astype(jnp.uint32))
    keep = (bits >> 1).astype(jnp.int32) >= _KEEP_THR
    wei = jnp.where(keep, wei * _KEEP_SCALE, 0.0)
    return jnp.einsum("bts,bsh->bth", wei, v)


if __name__ == "__main__":
    key = jax.random.PRNGKey(0)
    kx, kk, kq, kv = jax.random.split(key, 4)

    B, T = 2, BLOCK_SIZE                     # small batch, full block_size seq
    x = jax.random.normal(kx, (B, T, N_EMBD), dtype=jnp.float32)

    # Deterministic synthetic weights, kernel-layout (in, out) = (C, H).
    wk = 0.02 * jax.random.normal(kk, (N_EMBD, HEAD_SIZE), dtype=jnp.float32)
    wq = 0.02 * jax.random.normal(kq, (N_EMBD, HEAD_SIZE), dtype=jnp.float32)
    wv = 0.02 * jax.random.normal(kv, (N_EMBD, HEAD_SIZE), dtype=jnp.float32)

    seed = jnp.array([1234], dtype=jnp.int32)

    y = head_forward(x, wk, wq, wv, seed)
    jax.block_until_ready(y)

    assert y.shape == (B, T, HEAD_SIZE)
    assert y.dtype == jnp.float32
    assert bool(jnp.all(jnp.isfinite(y)))

    y_ref = _reference(x, wk, wq, wv, seed)
    assert bool(jnp.allclose(y, y_ref, rtol=2e-2, atol=2e-2))

    print("KERNEL_OK")
</pallas_src>

<mosaic_0001>
module attributes {stable_mosaic.version = 11 : i64} {
  func.func @_head_kernel(%arg0: i32, %arg1: memref<1xi32, #tpu.memory_space<smem>>, %arg2: memref<1x128x256xf32, #tpu.memory_space<vmem>>, %arg3: memref<256x64xf32, #tpu.memory_space<vmem>>, %arg4: memref<256x64xf32, #tpu.memory_space<vmem>>, %arg5: memref<256x64xf32, #tpu.memory_space<vmem>>, %arg6: memref<1x128x64xf32, #tpu.memory_space<vmem>>) attributes {dimension_semantics = [#tpu.dimension_semantics<parallel>], iteration_bounds = array<i64: 2>, scalar_prefetch = 1 : i64, scratch_operands = 0 : i64, tpu.core_type = #tpu.core_type<tc>, window_params = [{transform_indices = @transform_0, window_bounds = array<i64: 1, 128, 256>}, {pipeline_mode = #tpu.pipeline_mode<synchronous>, transform_indices = @transform_1, window_bounds = array<i64: 256, 64>}, {pipeline_mode = #tpu.pipeline_mode<synchronous>, transform_indices = @transform_2, window_bounds = array<i64: 256, 64>}, {pipeline_mode = #tpu.pipeline_mode<synchronous>, transform_indices = @transform_3, window_bounds = array<i64: 256, 64>}, {transform_indices = @transform_4, window_bounds = array<i64: 1, 128, 64>}]} {
    %c0 = arith.constant 0 : index
    %c0_0 = arith.constant 0 : index
    %c0_1 = arith.constant 0 : index
    %0 = vector.load %arg2[%c0, %c0_0, %c0_1] : memref<1x128x256xf32, #tpu.memory_space<vmem>>, vector<1x128x256xf32>
    %1 = vector.shape_cast %0 : vector<1x128x256xf32> to vector<128x256xf32>
    %c0_2 = arith.constant 0 : index
    %c0_3 = arith.constant 0 : index
    %2 = vector.load %arg3[%c0_2, %c0_3] : memref<256x64xf32, #tpu.memory_space<vmem>>, vector<256x64xf32>
    %cst = arith.constant dense<0.000000e+00> : vector<128x64xf32>
    %3 = tpu.matmul %1, %2, %cst {dimension_numbers = #tpu.dot_dimension_numbers<[1], [0], [0], [1], [0, 0, 1, 1], [], []>} : vector<128x256xf32>, vector<256x64xf32>, vector<128x64xf32> -> vector<128x64xf32>
    %c0_4 = arith.constant 0 : index
    %c0_5 = arith.constant 0 : index
    %4 = vector.load %arg4[%c0_4, %c0_5] : memref<256x64xf32, #tpu.memory_space<vmem>>, vector<256x64xf32>
    %cst_6 = arith.constant dense<0.000000e+00> : vector<128x64xf32>
    %5 = tpu.matmul %1, %4, %cst_6 {dimension_numbers = #tpu.dot_dimension_numbers<[1], [0], [0], [1], [0, 0, 1, 1], [], []>} : vector<128x256xf32>, vector<256x64xf32>, vector<128x64xf32> -> vector<128x64xf32>
    %c0_7 = arith.constant 0 : index
    %c0_8 = arith.constant 0 : index
    %6 = vector.load %arg5[%c0_7, %c0_8] : memref<256x64xf32, #tpu.memory_space<vmem>>, vector<256x64xf32>
    %cst_9 = arith.constant dense<0.000000e+00> : vector<128x64xf32>
    %7 = tpu.matmul %1, %6, %cst_9 {dimension_numbers = #tpu.dot_dimension_numbers<[1], [0], [0], [1], [0, 0, 1, 1], [], []>} : vector<128x256xf32>, vector<256x64xf32>, vector<128x64xf32> -> vector<128x64xf32>
    %8 = tpu.transpose %3, [1, 0] : vector<128x64xf32> -> vector<64x128xf32>
    %cst_10 = arith.constant dense<0.000000e+00> : vector<128x128xf32>
    %9 = tpu.matmul %5, %8, %cst_10 {dimension_numbers = #tpu.dot_dimension_numbers<[1], [0], [0], [1], [0, 0, 1, 1], [], []>} : vector<128x64xf32>, vector<64x128xf32>, vector<128x128xf32> -> vector<128x128xf32>
    %cst_11 = arith.constant 6.250000e-02 : f32
    %10 = vector.broadcast %cst_11 : f32 to vector<128x128xf32>
    %11 = arith.mulf %9, %10 : vector<128x128xf32>
    %c0_12 = arith.constant 0 : index
    %12 = memref.load %arg1[%c0_12] : memref<1xi32, #tpu.memory_space<smem>>
    %13 = tpu.iota {dimensions = array<i32: 0>} : vector<128x128xi32>
    %14 = tpu.iota {dimensions = array<i32: 1>} : vector<128x128xi32>
    %c2_i32 = arith.constant 2 : i32
    %15 = arith.muli %12, %c2_i32 : i32
    %16 = arith.addi %15, %arg0 : i32
    %c16384_i32 = arith.constant 16384 : i32
    %17 = arith.muli %16, %c16384_i32 : i32
    %c128_i32 = arith.constant 128 : i32
    %18 = vector.broadcast %c128_i32 : i32 to vector<128x128xi32>
    %19 = arith.muli %13, %18 : vector<128x128xi32>
    %20 = vector.broadcast %17 : i32 to vector<128x128xi32>
    %21 = arith.addi %20, %19 : vector<128x128xi32>
    %22 = arith.addi %21, %14 : vector<128x128xi32>
    %c16_i32 = arith.constant 16 : i32
    %23 = vector.broadcast %c16_i32 : i32 to vector<128x128xi32>
    %24 = arith.shrui %22, %23 : vector<128x128xi32>
    %25 = arith.xori %22, %24 : vector<128x128xi32>
    %c2146121005_i32 = arith.constant 2146121005 : i32
    %26 = vector.broadcast %c2146121005_i32 : i32 to vector<128x128xi32>
    %27 = arith.muli %25, %26 : vector<128x128xi32>
    %c15_i32 = arith.constant 15 : i32
    %28 = vector.broadcast %c15_i32 : i32 to vector<128x128xi32>
    %29 = arith.shrui %27, %28 : vector<128x128xi32>
    %30 = arith.xori %27, %29 : vector<128x128xi32>
    %c-2073254261_i32 = arith.constant -2073254261 : i32
    %31 = vector.broadcast %c-2073254261_i32 : i32 to vector<128x128xi32>
    %32 = arith.muli %30, %31 : vector<128x128xi32>
    %c16_i32_13 = arith.constant 16 : i32
    %33 = vector.broadcast %c16_i32_13 : i32 to vector<128x128xi32>
    %34 = arith.shrui %32, %33 : vector<128x128xi32>
    %35 = arith.xori %32, %34 : vector<128x128xi32>
    %c1_i32 = arith.constant 1 : i32
    %36 = vector.broadcast %c1_i32 : i32 to vector<128x128xi32>
    %37 = arith.shrui %35, %36 : vector<128x128xi32>
    %c429496729_i32 = arith.constant 429496729 : i32
    %38 = vector.broadcast %c429496729_i32 : i32 to vector<128x128xi32>
    %39 = arith.cmpi sge, %37, %38 : vector<128x128xi32>
    %40 = arith.cmpi sle, %14, %13 : vector<128x128xi32>
    %cst_14 = arith.constant 0xFF800000 : f32
    %41 = vector.broadcast %cst_14 : f32 to vector<128x128xf32>
    %42 = arith.select %40, %11, %41 : vector<128x128xi1>, vector<128x128xf32>
    %cst_15 = arith.constant dense<0xFF800000> : vector<128xf32>
    %43 = vector.multi_reduction <maximumf>, %42, %cst_15 [1] : vector<128x128xf32> to vector<128xf32>
    %44 = vector.shape_cast %43 : vector<128xf32> to vector<128x1xf32>
    %45 = vector.broadcast %44 : vector<128x1xf32> to vector<128x128xf32>
    %46 = arith.subf %42, %45 : vector<128x128xf32>
    %47 = math.exp %46 : vector<128x128xf32>
    %cst_16 = arith.constant dense<0.000000e+00> : vector<128xf32>
    %48 = vector.multi_reduction <add>, %47, %cst_16 [1] : vector<128x128xf32> to vector<128xf32>
    %49 = vector.shape_cast %48 : vector<128xf32> to vector<128x1xf32>
    %50 = vector.broadcast %49 : vector<128x1xf32> to vector<128x128xf32>
    %51 = arith.divf %47, %50 : vector<128x128xf32>
    %cst_17 = arith.constant 1.250000e+00 : f32
    %52 = vector.broadcast %cst_17 : f32 to vector<128x128xf32>
    %53 = arith.mulf %51, %52 : vector<128x128xf32>
    %cst_18 = arith.constant 0.000000e+00 : f32
    %54 = vector.broadcast %cst_18 : f32 to vector<128x128xf32>
    %55 = arith.select %39, %53, %54 : vector<128x128xi1>, vector<128x128xf32>
    %cst_19 = arith.constant dense<0.000000e+00> : vector<128x64xf32>
    %56 = tpu.matmul %55, %7, %cst_19 {dimension_numbers = #tpu.dot_dimension_numbers<[1], [0], [0], [1], [0, 0, 1, 1], [], []>} : vector<128x128xf32>, vector<128x64xf32>, vector<128x64xf32> -> vector<128x64xf32>
    %57 = vector.shape_cast %56 : vector<128x64xf32> to vector<1x128x64xf32>
    %c0_20 = arith.constant 0 : index
    %c0_21 = arith.constant 0 : index
    %c0_22 = arith.constant 0 : index
    %58 = vector.load %arg6[%c0_20, %c0_21, %c0_22] : memref<1x128x64xf32, #tpu.memory_space<vmem>>, vector<1x128x64xf32>
    tpu.vector_store %arg6[%c0_20, %c0_21, %c0_22], %57 {strides = array<i32>} : memref<1x128x64xf32, #tpu.memory_space<vmem>>, vector<1x128x64xf32>,
    return
  }
  func.func @transform_0(%arg0: i32, %arg1: memref<1xi32, #tpu.memory_space<smem>>) -> (i32, i32, i32) {
    %c0_i32 = arith.constant 0 : i32
    %c0_i32_0 = arith.constant 0 : i32
    %c0_i32_1 = arith.constant 0 : i32
    return %arg0, %c0_i32, %c0_i32_0 : i32, i32, i32
  }
  func.func @transform_1(%arg0: i32, %arg1: memref<1xi32, #tpu.memory_space<smem>>) -> (i32, i32) {
    %c0_i32 = arith.constant 0 : i32
    %c0_i32_0 = arith.constant 0 : i32
    %c0_i32_1 = arith.constant 0 : i32
    return %c0_i32, %c0_i32_0 : i32, i32
  }
  func.func @transform_2(%arg0: i32, %arg1: memref<1xi32, #tpu.memory_space<smem>>) -> (i32, i32) {
    %c0_i32 = arith.constant 0 : i32
    %c0_i32_0 = arith.constant 0 : i32
    %c0_i32_1 = arith.constant 0 : i32
    return %c0_i32, %c0_i32_0 : i32, i32
  }
  func.func @transform_3(%arg0: i32, %arg1: memref<1xi32, #tpu.memory_space<smem>>) -> (i32, i32) {
    %c0_i32 = arith.constant 0 : i32
    %c0_i32_0 = arith.constant 0 : i32
    %c0_i32_1 = arith.constant 0 : i32
    return %c0_i32, %c0_i32_0 : i32, i32
  }
  func.func @transform_4(%arg0: i32, %arg1: memref<1xi32, #tpu.memory_space<smem>>) -> (i32, i32, i32) {
    %c0_i32 = arith.constant 0 : i32
    %c0_i32_0 = arith.constant 0 : i32
    %c0_i32_1 = arith.constant 0 : i32
    return %arg0, %c0_i32, %c0_i32_0 : i32, i32, i32
  }
}

</mosaic_0001>

<bundles_post_ra>
// kernel: head_forward.1
= control target key start
LH: loop header
LB: loop body
LE: loop exit
PB: predicated region body
PF: predicated region fallthrough
CT: control target
= control target key end

     0   :  { %s2269_s20 = smov 0   ;;  %s3330_s0 = inlined_call_operand.<no memory space> [shape: s32[1], index: 0, kind: input, shape index: {}]   ;;  %s3331_s1 = inlined_call_operand.vmem [shape: f32[2,128,256], index: 1, kind: input, shape index: {}]   ;;  %s3332_s2 = inlined_call_operand.vmem [shape: f32[256,64], index: 2, kind: input, shape index: {}]   ;;  %s3333_s3 = inlined_call_operand.vmem [shape: f32[256,64], index: 3, kind: input, shape index: {}]   ;;  %s3334_s4 = inlined_call_operand.vmem [shape: f32[256,64], index: 4, kind: input, shape index: {}]   ;;  %s3335_s5 = inlined_call_operand.vmem [shape: f32[2,128,64], index: 5, kind: output, shape index: {}]  }
   0x1   :  { %10 = sst [smem:[#allocation3]] %s3330_s0 }
   0x2 LB: > { %s2275_s21 = sadd.s32 4294967295, %s2234_s20   ;;  %p1681_p0 = scmp.ge.s32.totalorder %s2234_s20, 1  ;;  %s2234_s20 = sphi %s2269_s20, %s16_s20  }
   0x3   : > { %p164_p1 = scmp.lt.s32.totalorder %s2234_s20, 3 }
   0x5   : > { %p165_p2 = pnand %p1681_p0, %p164_p1 }
   0x7   : > { %168 = sbr.rel (%p165_p2) target bundleno = 1104 (0x450), region = 36 }
   0xc   : > { %v263_v0 = vld [vmem:[%s3332_s2 + $0xf8] sm:$0xff]  ;;  %v262_v2 = vld [vmem:[%s3332_s2 + $0xf0] sm:$0xff]  ;;  %p190_p3 = scmp.lt.s32.totalorder %s2275_s21, 1  ;;  %v261_v4 = vld [vmem:[%s3332_s2 + $0xe8] sm:$0xff]  ;;  %vm763_vm0 = vcmask 523264   ;;  %s1021_s13 = sld [smem:[#allocation3]] }
   0xd   : > { %v247_v1 = vld [vmem:[%s3332_s2 + $0x78] sm:$0xff]  ;;  %1740 = vmatprep.subr.mxu0 %v263_v0  ;;  %v246_v3 = vld [vmem:[%s3332_s2 + $0x70] sm:$0xff]  ;;  %v245_v5 = vld [vmem:[%s3332_s2 + $0x68] sm:$0xff] }
   0xe   : > { %1741 = vmatpush3.msra.mxu0 %v247_v1  ;;  %s2296_s6 = scalar_select %p190_p3, %s2275_s21, 1  ;;  %v260_v6 = vld [vmem:[%s3332_s2 + $0xe0] sm:$0xff]  ;;  %v259_v8 = vld [vmem:[%s3332_s2 + $0xd8] sm:$0xff]  ;;  %v258_v10 = vld [vmem:[%s3332_s2 + $0xd0] sm:$0xff] }
   0xf   : > { %1742 = vmatprep.subr.mxu0 %v262_v2  ;;  %v244_v7 = vld [vmem:[%s3332_s2 + $0x60] sm:$0xff]  ;;  %v243_v9 = vld [vmem:[%s3332_s2 + $0x58] sm:$0xff]  ;;  %v242_v11 = vld [vmem:[%s3332_s2 + $0x50] sm:$0xff] }
  0x10   : > { %1743 = vmatpush3.msra.mxu0 %v246_v3  ;;  %s1738_s11 = sshll.u32 %s2296_s6, 8  ;;  %v257_v12 = vld [vmem:[%s3332_s2 + $0xc8] sm:$0xff]  ;;  %v256_v15 = vld [vmem:[%s3332_s2 + $0xc0] sm:$0xff]  ;;  %v255_v17 = vld [vmem:[%s3332_s2 + $0xb8] sm:$0xff] }
  0x11   : > { %1744 = vmatprep.subr.mxu0 %v261_v4  ;;  %s2317_s22 = scalar_lea.vmem %s3331_s1, %s1738_s11  ;;  %v241_v14 = vld [vmem:[%s3332_s2 + $0x48] sm:$0xff]  ;;  %v240_v16 = vld [vmem:[%s3332_s2 + $0x40] sm:$0xff]  ;;  %v239_v18 = vld [vmem:[%s3332_s2 + $0x38] sm:$0xff] }
  0x12   : > { %1745 = vmatpush3.msra.mxu0 %v245_v5  ;;  %v2329_v13 = vld [vmem:[%s2317_s22 + $0x8] sm:$0xff]  ;;  %v254_v19 = vld [vmem:[%s3332_s2 + $0xb0] sm:$0xff]  ;;  %v252_v23 = vld [vmem:[%s3332_s2 + $0xa0] sm:$0xff]  ;;  %s1718_s14 = sshll.u32 %s1021_s13, 1 }
  0x13   : > { %1746 = vmatprep.subr.mxu0 %v260_v6  ;;  %328 = vmatprep.mubr.f32.mxu0 %v2329_v13  ;;  %v238_v20 = vld [vmem:[%s3332_s2 + $0x30] sm:$0xff]  ;;  %v253_v21 = vld [vmem:[%s3332_s2 + $0xa8] sm:$0xff]  ;;  %v236_v24 = vld [vmem:[%s3332_s2 + $0x20] sm:$0xff]  ;;  %s1042_s15 = sadd.s32 %s1718_s14, %s2275_s21  ;;  %s1739_s21 = sshll.u32 %s2296_s6, 7 }
  0x14   : > { %1747 = vmatpush3.msra.mxu0 %v244_v7  ;;  %505 = vmatprep.mubr.f32.mxu1 %v2329_v13  ;;  %v237_v22 = vld [vmem:[%s3332_s2 + $0x28] sm:$0xff]  ;;  %v440_v25 = vld [vmem:[%s3333_s3 + $0xf8] sm:$0xff]  ;;  %v439_v28 = vld [vmem:[%s3333_s3 + $0xf0] sm:$0xff]  ;;  %s1719_s16 = sshll.u32 %s1042_s15, 14  ;;  %s3293_s18 = scalar_lea.vmem %s3335_s5, %s1739_s21 }
  0x15   : > { %1748 = vmatprep.subr.mxu0 %v259_v8  ;;  %v424_v26 = vld [vmem:[%s3333_s3 + $0x78] sm:$0xff]  ;;  %1820 = vmatprep.subr.mxu1 %v440_v25  ;;  %v423_v29 = vld [vmem:[%s3333_s3 + $0x70] sm:$0xff]  ;;  %v438_v31 = vld [vmem:[%s3333_s3 + $0xe8] sm:$0xff] }
  0x16   : > { %1749 = vmatpush3.msra.mxu0 %v243_v9  ;;  %v251_v27 = vld [vmem:[%s3332_s2 + $0x98] sm:$0xff]  ;;  %1821 = vmatpush3.msra.mxu1 %v424_v26  ;;  %v250_v32 = vld [vmem:[%s3332_s2 + $0x90] sm:$0xff]  ;;  %v422_v33 = vld [vmem:[%s3333_s3 + $0x68] sm:$0xff] }
  0x17   : > { %1750 = vmatprep.subr.mxu0 %v258_v10  ;;  %v235_v30 = vld [vmem:[%s3332_s2 + $0x18] sm:$0xff]  ;;  %1822 = vmatprep.subr.mxu1 %v439_v28  ;;  %v234_v34 = vld [vmem:[%s3332_s2 + $0x10] sm:$0xff]  ;;  %v437_v35 = vld [vmem:[%s3333_s3 + $0xe0] sm:$0xff] }
  0x18   : > { %1751 = vmatpush3.msra.mxu0 %v242_v11  ;;  %1823 = vmatpush3.msra.mxu1 %v423_v29  ;;  %v249_v36 = vld [vmem:[%s3332_s2 + $0x88] sm:$0xff]  ;;  %v421_v37 = vld [vmem:[%s3333_s3 + $0x60] sm:$0xff]  ;;  %v436_v39 = vld [vmem:[%s3333_s3 + $0xd8] sm:$0xff] }
  0x19   : > { %1752 = vmatprep.subr.mxu0 %v257_v12  ;;  %1824 = vmatprep.subr.mxu1 %v438_v31  ;;  %v233_v38 = vld [vmem:[%s3332_s2 + $0x8] sm:$0xff]  ;;  %v248_v40 = vld [vmem:[%s3332_s2 + $0x80] sm:$0xff]  ;;  %v420_v41 = vld [vmem:[%s3333_s3 + $0x58] sm:$0xff] }
  0x1a   : > { %1753 = vmatpush3.msra.mxu0 %v241_v14  ;;  %1825 = vmatpush3.msra.mxu1 %v422_v33  ;;  %v232_v42 = vld [vmem:[%s3332_s2] sm:$0xff]  ;;  %v435_v43 = vld [vmem:[%s3333_s3 + $0xd0] sm:$0xff]  ;;  %v2430_v46 = vld [vmem:[%s2317_s22 + $0x18] sm:$0xff] }
  0x1b   : > { %1754 = vmatprep.subr.mxu0 %v256_v15  ;;  %1826 = vmatprep.subr.mxu1 %v437_v35  ;;  %v2424_v44 = vld [vmem:[%s2317_s22] sm:$0xff]  ;;  %v419_v45 = vld [vmem:[%s3333_s3 + $0x50] sm:$0xff]  ;;  %v434_v47 = vld [vmem:[%s3333_s3 + $0xc8] sm:$0xff] }
  0x1c   : > { %1755 = vmatpush3.msra.mxu0 %v240_v16  ;;  %1827 = vmatpush3.msra.mxu1 %v421_v37  ;;  %v418_v48 = vld [vmem:[%s3333_s3 + $0x48] sm:$0xff]  ;;  %v433_v49 = vld [vmem:[%s3333_s3 + $0xc0] sm:$0xff]  ;;  %v2444_v50 = vld [vmem:[%s2317_s22 + $0x10] sm:$0xff] }
  0x1d   : > { %1756 = vmatprep.subr.mxu0 %v255_v17  ;;  %1828 = vmatprep.subr.mxu1 %v436_v39  ;;  %v417_v51 = vld [vmem:[%s3333_s3 + $0x40] sm:$0xff]  ;;  %v2450_v52 = vld [vmem:[%s2317_s22 + $0x28] sm:$0xff]  ;;  %v432_v53 = vld [vmem:[%s3333_s3 + $0xb8] sm:$0xff] }
  0x1e   : > { %1757 = vmatpush3.msra.mxu0 %v239_v18  ;;  %1829 = vmatpush3.msra.mxu1 %v420_v41  ;;  %v416_v54 = vld [vmem:[%s3333_s3 + $0x38] sm:$0xff]  ;;  %v431_v55 = vld [vmem:[%s3333_s3 + $0xb0] sm:$0xff]  ;;  %v2464_v56 = vld [vmem:[%s2317_s22 + $0x20] sm:$0xff] }
  0x1f   : > { %1758 = vmatprep.subr.mxu0 %v254_v19  ;;  %1830 = vmatprep.subr.mxu1 %v435_v43  ;;  %v415_v57 = vld [vmem:[%s3333_s3 + $0x30] sm:$0xff]  ;;  %v2470_v58 = vld [vmem:[%s2317_s22 + $0x38] sm:$0xff]  ;;  %v430_v59 = vld [vmem:[%s3333_s3 + $0xa8] sm:$0xff] }
  0x20   : > { %1759 = vmatpush3.msra.mxu0 %v238_v20  ;;  %1831 = vmatpush3.msra.mxu1 %v419_v45  ;;  %v414_v60 = vld [vmem:[%s3333_s3 + $0x28] sm:$0xff]  ;;  %v429_v61 = vld [vmem:[%s3333_s3 + $0xa0] sm:$0xff]  ;;  %v2484_v62 = vld [vmem:[%s2317_s22 + $0x30] sm:$0xff] }
  0x21   : > { %1760 = vmatprep.subr.mxu0 %v253_v21  ;;  %1832 = vmatprep.subr.mxu1 %v434_v47  ;;  %v413_v63 = vld [vmem:[%s3333_s3 + $0x20] sm:$0xff]  ;;  %v2490_v0 = vld [vmem:[%s2317_s22 + $0x48] sm:$0xff]  ;;  %v428_v1 = vld [vmem:[%s3333_s3 + $0x98] sm:$0xff] }
  0x22   : > { %1761 = vmatpush3.msra.mxu0 %v237_v22  ;;  %1833 = vmatpush3.msra.mxu1 %v418_v48  ;;  %v412_v2 = vld [vmem:[%s3333_s3 + $0x18] sm:$0xff]  ;;  %v427_v3 = vld [vmem:[%s3333_s3 + $0x90] sm:$0xff]  ;;  %v2504_v4 = vld [vmem:[%s2317_s22 + $0x40] sm:$0xff] }
  0x23   : > { %1762 = vmatprep.subr.mxu0 %v252_v23  ;;  %1834 = vmatprep.subr.mxu1 %v433_v49  ;;  %v411_v5 = vld [vmem:[%s3333_s3 + $0x10] sm:$0xff]  ;;  %v2510_v6 = vld [vmem:[%s2317_s22 + $0x58] sm:$0xff]  ;;  %v426_v7 = vld [vmem:[%s3333_s3 + $0x88] sm:$0xff] }
  0x24   : > { %1763 = vmatpush3.msra.mxu0 %v236_v24  ;;  %1835 = vmatpush3.msra.mxu1 %v417_v51  ;;  %v410_v8 = vld [vmem:[%s3333_s3 + $0x8] sm:$0xff]  ;;  %v425_v9 = vld [vmem:[%s3333_s3 + $0x80] sm:$0xff]  ;;  %v2524_v10 = vld [vmem:[%s2317_s22 + $0x50] sm:$0xff] }
  0x25   : > { %1764 = vmatprep.subr.mxu0 %v251_v27  ;;  %1836 = vmatprep.subr.mxu1 %v432_v53  ;;  %v409_v11 = vld [vmem:[%s3333_s3] sm:$0xff]  ;;  %v2530_v12 = vld [vmem:[%s2317_s22 + $0x68] sm:$0xff]  ;;  %v2539_v15 = vld [vmem:[%s2317_s22 + $0x78] sm:$0xff] }
  0x26   : > { %1765 = vmatpush3.msra.mxu0 %v235_v30  ;;  %1837 = vmatpush3.msra.mxu1 %v416_v54  ;;  %v2535_v14 = vld [vmem:[%s2317_s22 + $0x60] sm:$0xff]  ;;  %v2545_v16 = vld [vmem:[%s2317_s22 + $0x70] sm:$0xff]  ;;  %v2549_v17 = vld [vmem:[%s2317_s22 + $0x88] sm:$0xff] }
  0x27   : > { %1766 = vmatprep.subr.mxu0 %v250_v32  ;;  %1838 = vmatprep.subr.mxu1 %v431_v55  ;;  %v2555_v18 = vld [vmem:[%s2317_s22 + $0x80] sm:$0xff]  ;;  %v2559_v19 = vld [vmem:[%s2317_s22 + $0x98] sm:$0xff]  ;;  %v2565_v20 = vld [vmem:[%s2317_s22 + $0x90] sm:$0xff] }
  0x28   : > { %1767 = vmatpush3.msra.mxu0 %v234_v34  ;;  %1839 = vmatpush3.msra.mxu1 %v415_v57  ;;  %v2569_v21 = vld [vmem:[%s2317_s22 + $0xa8] sm:$0xff]  ;;  %v2575_v22 = vld [vmem:[%s2317_s22 + $0xa0] sm:$0xff]  ;;  %v2579_v23 = vld [vmem:[%s2317_s22 + $0xb8] sm:$0xff] }
  0x29   : > { %1768 = vmatprep.subr.mxu0 %v249_v36  ;;  %1840 = vmatprep.subr.mxu1 %v430_v59  ;;  %v2585_v24 = vld [vmem:[%s2317_s22 + $0xb0] sm:$0xff]  ;;  %v2589_v25 = vld [vmem:[%s2317_s22 + $0xc8] sm:$0xff]  ;;  %v2595_v26 = vld [vmem:[%s2317_s22 + $0xc0] sm:$0xff] }
  0x2a   : > { %1769 = vmatpush3.msra.mxu0 %v233_v38  ;;  %1841 = vmatpush3.msra.mxu1 %v414_v60  ;;  %v2599_v27 = vld [vmem:[%s2317_s22 + $0xd8] sm:$0xff]  ;;  %v2605_v28 = vld [vmem:[%s2317_s22 + $0xd0] sm:$0xff]  ;;  %v2609_v29 = vld [vmem:[%s2317_s22 + $0xe8] sm:$0xff] }
  0x2b   : > { %1770 = vmatprep.subr.mxu0 %v248_v40  ;;  %1842 = vmatprep.subr.mxu1 %v429_v61  ;;  %v2615_v30 = vld [vmem:[%s2317_s22 + $0xe0] sm:$0xff]  ;;  %v2619_v31 = vld [vmem:[%s2317_s22 + $0xf8] sm:$0xff]  ;;  %v2625_v32 = vld [vmem:[%s2317_s22 + $0xf0] sm:$0xff] }
  0x2c   : > { %1771 = vmatpush3.msra.mxu0 %v232_v42  ;;  %1843 = vmatpush3.msra.mxu1 %v413_v63 }
  0x2d   : > { %329 = vmatmul.mubr.f32.vlgmr.msra.gmra.mxu0 %v2424_v44  ;;  %1844 = vmatprep.subr.mxu1 %v428_v1  ;;  %v617_v1 = vld [vmem:[%s3334_s4 + $0xf8] sm:$0xff] }
  0x2e   : > { %333 = vmatprep.mubr.f32.mxu0 %v2430_v46  ;;  %1845 = vmatpush3.msra.mxu1 %v412_v2  ;;  %v601_v2 = vld [vmem:[%s3334_s4 + $0x78] sm:$0xff] }
  0x2f   : > { %1846 = vmatprep.subr.mxu1 %v427_v3  ;;  %v616_v3 = vld [vmem:[%s3334_s4 + $0xf0] sm:$0xff]  ;;  %1900 = vmatprep.subr.mxu0 %v617_v1  ;;  %v594_v1 = vld [vmem:[%s3334_s4 + $0x40] sm:$0xff] }
  0x30   : > { %1847 = vmatpush3.msra.mxu1 %v411_v5  ;;  %1901 = vmatpush3.msra.mxu0 %v601_v2  ;;  %v609_v2 = vld [vmem:[%s3334_s4 + $0xb8] sm:$0xff] }
  0x31   : > { %334 = vmatmul.mubr.f32.gmra.mxu0 %v2444_v50  ;;  %1848 = vmatprep.subr.mxu1 %v426_v7  ;;  %v600_v7 = vld [vmem:[%s3334_s4 + $0x70] sm:$0xff] }
  0x32   : > { %338 = vmatprep.mubr.f32.mxu0 %v2450_v52  ;;  %1849 = vmatpush3.msra.mxu1 %v410_v8  ;;  %v615_v8 = vld [vmem:[%s3334_s4 + $0xe8] sm:$0xff] }
  0x33   : > { %1850 = vmatprep.subr.mxu1 %v425_v9  ;;  %1902 = vmatprep.subr.mxu0 %v616_v3 }
  0x34   : > { %1851 = vmatpush3.msra.mxu1 %v409_v11  ;;  %v599_v11 = vld [vmem:[%s3334_s4 + $0x68] sm:$0xff]  ;;  %1903 = vmatpush3.msra.mxu0 %v600_v7  ;;  %v593_v7 = vld [vmem:[%s3334_s4 + $0x38] sm:$0xff] }
  0x35   : > { %339 = vmatmul.mubr.f32.gmra.mxu0 %v2464_v56  ;;  %506 = vmatmul.mubr.f32.vlgmr.msra.gmra.mxu1 %v2424_v44 }
  0x36   : > { %343 = vmatprep.mubr.f32.mxu0 %v2470_v58  ;;  %510 = vmatprep.mubr.f32.mxu1 %v2430_v46 }
  0x37   : > { %1904 = vmatprep.subr.mxu0 %v615_v8  ;;  %v608_v8 = vld [vmem:[%s3334_s4 + $0xb0] sm:$0xff] }
  0x38   : > { %1905 = vmatpush3.msra.mxu0 %v599_v11 }
  0x39   : > { %344 = vmatmul.mubr.f32.gmra.mxu0 %v2484_v62  ;;  %511 = vmatmul.mubr.f32.gmra.mxu1 %v2444_v50 }
  0x3a   : > { %348 = vmatprep.mubr.f32.mxu0 %v2490_v0  ;;  %515 = vmatprep.mubr.f32.mxu1 %v2450_v52 }
  0x3d   : > { %349 = vmatmul.mubr.f32.gmra.mxu0 %v2504_v4  ;;  %516 = vmatmul.mubr.f32.gmra.mxu1 %v2464_v56 }
  0x3e   : > { %353 = vmatprep.mubr.f32.mxu0 %v2510_v6  ;;  %520 = vmatprep.mubr.f32.mxu1 %v2470_v58 }
  0x41   : > { %354 = vmatmul.mubr.f32.gmra.mxu0 %v2524_v10  ;;  %521 = vmatmul.mubr.f32.gmra.mxu1 %v2484_v62 }
  0x42   : > { %358 = vmatprep.mubr.f32.mxu0 %v2530_v12  ;;  %525 = vmatprep.mubr.f32.mxu1 %v2490_v0 }
  0x45   : > { %359 = vmatmul.mubr.f32.gmra.mxu0 %v2535_v14  ;;  %526 = vmatmul.mubr.f32.gmra.mxu1 %v2504_v4 }
  0x46   : > { %363 = vmatprep.mubr.f32.mxu0 %v2539_v15  ;;  %530 = vmatprep.mubr.f32.mxu1 %v2510_v6 }
  0x49   : > { %364 = vmatmul.mubr.f32.gmra.mxu0 %v2545_v16  ;;  %531 = vmatmul.mubr.f32.gmra.mxu1 %v2524_v10 }
  0x4a   : > { %368 = vmatprep.mubr.f32.mxu0 %v2549_v17  ;;  %535 = vmatprep.mubr.f32.mxu1 %v2530_v12 }
  0x4d   : > { %369 = vmatmul.mubr.f32.gmra.mxu0 %v2555_v18  ;;  %536 = vmatmul.mubr.f32.gmra.mxu1 %v2535_v14 }
  0x4e   : > { %373 = vmatprep.mubr.f32.mxu0 %v2559_v19  ;;  %540 = vmatprep.mubr.f32.mxu1 %v2539_v15 }
  0x51   : > { %374 = vmatmul.mubr.f32.gmra.mxu0 %v2565_v20  ;;  %541 = vmatmul.mubr.f32.gmra.mxu1 %v2545_v16 }
  0x52   : > { %378 = vmatprep.mubr.f32.mxu0 %v2569_v21  ;;  %545 = vmatprep.mubr.f32.mxu1 %v2549_v17 }
  0x55   : > { %379 = vmatmul.mubr.f32.gmra.mxu0 %v2575_v22  ;;  %546 = vmatmul.mubr.f32.gmra.mxu1 %v2555_v18 }
  0x56   : > { %383 = vmatprep.mubr.f32.mxu0 %v2579_v23  ;;  %550 = vmatprep.mubr.f32.mxu1 %v2559_v19 }
  0x59   : > { %384 = vmatmul.mubr.f32.gmra.mxu0 %v2585_v24  ;;  %551 = vmatmul.mubr.f32.gmra.mxu1 %v2565_v20 }
  0x5a   : > { %388 = vmatprep.mubr.f32.mxu0 %v2589_v25  ;;  %555 = vmatprep.mubr.f32.mxu1 %v2569_v21 }
  0x5d   : > { %389 = vmatmul.mubr.f32.gmra.mxu0 %v2595_v26  ;;  %556 = vmatmul.mubr.f32.gmra.mxu1 %v2575_v22 }
  0x5e   : > { %393 = vmatprep.mubr.f32.mxu0 %v2599_v27  ;;  %560 = vmatprep.mubr.f32.mxu1 %v2579_v23 }
  0x61   : > { %394 = vmatmul.mubr.f32.gmra.mxu0 %v2605_v28  ;;  %561 = vmatmul.mubr.f32.gmra.mxu1 %v2585_v24 }
  0x62   : > { %398 = vmatprep.mubr.f32.mxu0 %v2609_v29  ;;  %565 = vmatprep.mubr.f32.mxu1 %v2589_v25 }
  0x65   : > { %399 = vmatmul.mubr.f32.gmra.mxu0 %v2615_v30  ;;  %566 = vmatmul.mubr.f32.gmra.mxu1 %v2595_v26 }
  0x66   : > { %403 = vmatprep.mubr.f32.mxu0 %v2619_v31  ;;  %570 = vmatprep.mubr.f32.mxu1 %v2599_v27 }
  0x69   : > { %404 = vmatmul.mubr.f32.gmra.mxu0 %v2625_v32  ;;  %571 = vmatmul.mubr.f32.gmra.mxu1 %v2605_v28 }
  0x6a   : > { %682 = vmatprep.mubr.f32.mxu0 %v2329_v13  ;;  %575 = vmatprep.mubr.f32.mxu1 %v2609_v29 }
  0x6d   : > { %576 = vmatmul.mubr.f32.gmra.mxu1 %v2615_v30 }
  0x6e   : > { %580 = vmatprep.mubr.f32.mxu1 %v2619_v31 }
  0x71   : > { %581 = vmatmul.mubr.f32.gmra.mxu1 %v2625_v32 }
  0xed   : > { %v1772_v13 = vpop.f32.mrf.mxu0 }
  0xef   : > { %v1773_v33 = vpop.f32.mrf.mxu0 }
  0xf0   : > { %v2642_v34 = vadd.f32 %v1773_v33, %v1772_v13  ;;  %v614_v13 = vld [vmem:[%s3334_s4 + $0xe0] sm:$0xff] }
  0xf1   : > { %v1775_v35 = vpop.f32.mrf.mxu0  ;;  %1906 = vmatprep.subr.mxu0 %v614_v13 }
  0xf3   : > { %v1776_v36 = vpop.f32.mrf.mxu0 }
  0xf4   : > { %v2644_v37 = vadd.f32 %v1776_v36, %v1775_v35  ;;  %v598_v36 = vld [vmem:[%s3334_s4 + $0x60] sm:$0xff] }
  0xf5   : > { %v1778_v38 = vpop.f32.mrf.mxu0  ;;  %v1852_v51 = vpop.f32.mrf.mxu1  ;;  %1907 = vmatpush3.msra.mxu0 %v598_v36  ;;  %v592_v36 = vld [vmem:[%s3334_s4 + $0x30] sm:$0xff] }
  0xf7   : > { %v1779_v39 = vpop.f32.mrf.mxu0  ;;  %v1853_v55 = vpop.f32.mrf.mxu1 }
  0xf8   : > { %v2646_v40 = vadd.f32 %v1779_v39, %v1778_v38  ;;  %v1854_v59 = vadd.f32 %v1853_v55, %v1852_v51  ;;  %v613_v38 = vld [vmem:[%s3334_s4 + $0xd8] sm:$0xff]  ;;  %v611_v51 = vld [vmem:[%s3334_s4 + $0xc8] sm:$0xff] }
  0xf9   : > { %v1781_v41 = vpop.f32.mrf.mxu0  ;;  %v2686_v35 = vpop.f32.mrf.mxu1  ;;  %1908 = vmatprep.subr.mxu0 %v613_v38  ;;  %v595_v55 = vld [vmem:[%s3334_s4 + $0x48] sm:$0xff] }
  0xfa   : > { %2076 = vmatprep.mubr.msk.f32.mxu1 %vm763_vm0, %v1854_v59  ;;  %3341 = vst [vmem:[#allocation4_spill] sm:$0xff] %v2686_v35  ;;  %v607_v38 = vld [vmem:[%s3334_s4 + $0xa8] sm:$0xff] }
  0xfb   : > { %v1782_v42 = vpop.f32.mrf.mxu0 }
  0xfc   : > { %v2648_v43 = vadd.f32 %v1782_v42, %v1781_v41  ;;  %v597_v41 = vld [vmem:[%s3334_s4 + $0x58] sm:$0xff]  ;;  %v612_v42 = vld [vmem:[%s3334_s4 + $0xd0] sm:$0xff] }
  0xfd   : > { %v1784_v45 = vpop.f32.mrf.mxu0  ;;  %1909 = vmatpush3.msra.mxu0 %v597_v41 }
  0xfe   : > { %1910 = vmatprep.subr.mxu0 %v612_v42  ;;  %v591_v42 = vld [vmem:[%s3334_s4 + $0x28] sm:$0xff] }
  0xff   : > { %v1785_v47 = vpop.f32.mrf.mxu0 }
 0x100   : > { %v2650_v48 = vadd.f32 %v1785_v47, %v1784_v45  ;;  %v2704_v47 = vpop.f32.mrf.mxu1 }
 0x101   : > { %v1787_v49 = vpop.f32.mrf.mxu0  ;;  %3342 = vst [vmem:[#allocation5_spill] sm:$0xff] %v2704_v47 }
 0x103   : > { %v1788_v53 = vpop.f32.mrf.mxu0 }
 0x104   : > { %v2652_v54 = vadd.f32 %v1788_v53, %v1787_v49  ;;  %v596_v49 = vld [vmem:[%s3334_s4 + $0x50] sm:$0xff] }
 0x105   : > { %v1790_v57 = vpop.f32.mrf.mxu0  ;;  %1911 = vmatpush3.msra.mxu0 %v596_v49  ;;  %v606_v49 = vld [vmem:[%s3334_s4 + $0xa0] sm:$0xff] }
 0x106   : > { %1912 = vmatprep.subr.mxu0 %v611_v51 }
 0x107   : > { %v1791_v60 = vpop.f32.mrf.mxu0  ;;  %1913 = vmatpush3.msra.mxu0 %v595_v55 }
 0x108   : > { %v2655_v61 = vadd.f32 %v1791_v60, %v1790_v57  ;;  %v610_v57 = vld [vmem:[%s3334_s4 + $0xc0] sm:$0xff]  ;;  %v2722_v60 = vpop.f32.mrf.mxu1 }
 0x109   : > { %v2657_v63 = vpop.f32.mrf.mxu0  ;;  %3343 = vst [vmem:[#allocation6_spill] sm:$0xff] %v2722_v60  ;;  %1914 = vmatprep.subr.mxu0 %v610_v57  ;;  %v590_v57 = vld [vmem:[%s3334_s4 + $0x20] sm:$0xff] }
 0x10a   : > { %1915 = vmatpush3.msra.mxu0 %v594_v1  ;;  %v2740_v13 = vpop.f32.mrf.mxu1  ;;  %v605_v1 = vld [vmem:[%s3334_s4 + $0x98] sm:$0xff] }
 0x10b   : > { %v2668_v5 = vpop.f32.mrf.mxu0  ;;  %3344 = vst [vmem:[#allocation7_spill] sm:$0xff] %v2740_v13  ;;  %1916 = vmatprep.subr.mxu0 %v609_v2 }
 0x10c   : > { %1917 = vmatpush3.msra.mxu0 %v593_v7  ;;  %v2754_v55 = vpop.f32.mrf.mxu1  ;;  %v589_v7 = vld [vmem:[%s3334_s4 + $0x18] sm:$0xff] }
 0x10d   : > { %v2676_v9 = vpop.f32.mrf.mxu0  ;;  %1918 = vmatprep.subr.mxu0 %v608_v8  ;;  %3345 = vst [vmem:[#allocation8_spill] sm:$0xff] %v2754_v55  ;;  %v604_v8 = vld [vmem:[%s3334_s4 + $0x90] sm:$0xff] }
 0x10e   : > { %1919 = vmatpush3.msra.mxu0 %v592_v36 }
 0x10f   : > { %v2684_v33 = vpop.f32.mrf.mxu0  ;;  %1920 = vmatprep.subr.mxu0 %v607_v38  ;;  %v2768_v38 = vpop.f32.mrf.mxu1 }
 0x110   : > { %1921 = vmatpush3.msra.mxu0 %v591_v42  ;;  %3346 = vst [vmem:[#allocation9_spill] sm:$0xff] %v2768_v38  ;;  %v588_v42 = vld [vmem:[%s3334_s4 + $0x10] sm:$0xff] }
 0x111   : > { %v2694_v39 = vpop.f32.mrf.mxu0  ;;  %1922 = vmatprep.subr.mxu0 %v606_v49  ;;  %v603_v49 = vld [vmem:[%s3334_s4 + $0x88] sm:$0xff]  ;;  %v2782_v13 = vpop.f32.mrf.mxu1 }
 0x112   : > { %1923 = vmatpush3.msra.mxu0 %v590_v57  ;;  %v587_v57 = vld [vmem:[%s3334_s4 + $0x8] sm:$0xff] }
 0x113   : > { %v2702_v45 = vpop.f32.mrf.mxu0  ;;  %1924 = vmatprep.subr.mxu0 %v605_v1  ;;  %v602_v1 = vld [vmem:[%s3334_s4 + $0x80] sm:$0xff]  ;;  %v2787_v47 = vpop.f32.mrf.mxu1 }
 0x114   : > { %1925 = vmatpush3.msra.mxu0 %v589_v7  ;;  %v586_v7 = vld [vmem:[%s3334_s4] sm:$0xff] }
 0x115   : > { %v2712_v53 = vpop.f32.mrf.mxu0  ;;  %1926 = vmatprep.subr.mxu0 %v604_v8 }
 0x116   : > { %1927 = vmatpush3.msra.mxu0 %v588_v42 }
 0x117   : > { %v2720_v59 = vpop.f32.mrf.mxu0  ;;  %1928 = vmatprep.subr.mxu0 %v603_v49  ;;  %v2793_v49 = vpop.f32.mrf.mxu1 }
 0x118   : > { %1929 = vmatpush3.msra.mxu0 %v587_v57 }
 0x119   : > { %v2730_v3 = vpop.f32.mrf.mxu0  ;;  %1930 = vmatprep.subr.mxu0 %v602_v1 }
 0x11a   : > { %1931 = vmatpush3.msra.mxu0 %v586_v7 }
 0x11b   : > { %v2738_v11 = vpop.f32.mrf.mxu0  ;;  %683 = vmatmul.mubr.f32.vlgmr.msra.gmra.mxu0 %v2424_v44  ;;  %v2799_v44 = vpop.f32.mrf.mxu1 }
 0x11c   : > { %687 = vmatprep.mubr.f32.mxu0 %v2430_v46 }
 0x11d   : > { %v1808_v41 = vpop.f32.mrf.mxu0 }
 0x11f   : > { %v1809_v51 = vpop.f32.mrf.mxu0  ;;  %688 = vmatmul.mubr.f32.gmra.mxu0 %v2444_v50  ;;  %v1807_v50 = vadd.f32 %v2738_v11, %v2730_v3 }
 0x120   : > { %692 = vmatprep.mubr.f32.mxu0 %v2450_v52  ;;  %v1810_v46 = vadd.f32 %v1809_v51, %v1808_v41 }
 0x121   : > { %v1811_v2 = vpop.f32.mrf.mxu0 }
 0x123   : > { %v1812_v36 = vpop.f32.mrf.mxu0  ;;  %693 = vmatmul.mubr.f32.gmra.mxu0 %v2464_v56  ;;  %v1804_v56 = vadd.f32 %v2720_v59, %v2712_v53 }
 0x124   : > { %v1813_v57 = vadd.f32 %v1812_v36, %v1811_v2  ;;  %697 = vmatprep.mubr.f32.mxu0 %v2470_v58 }
 0x125   : > { %v1814_v55 = vpop.f32.mrf.mxu0 }
 0x127   : > { %v1815_v38 = vpop.f32.mrf.mxu0  ;;  %698 = vmatmul.mubr.f32.gmra.mxu0 %v2484_v62  ;;  %v1801_v62 = vadd.f32 %v2702_v45, %v2694_v39 }
 0x128   : > { %v1816_v35 = vadd.f32 %v1815_v38, %v1814_v55  ;;  %702 = vmatprep.mubr.f32.mxu0 %v2490_v0  ;;  %v1022_v55 = vlaneseq }
 0x129   : > { %v1817_v60 = vpop.f32.mrf.mxu0 }
 0x12a   : > { %v2921_v2 = vshrl.u32 %v1022_v55, 7  ;;  %v2923_v38 = vand.u32 127, %v1022_v55 }
 0x12b   : > { %v1818_v8 = vpop.f32.mrf.mxu0  ;;  %703 = vmatmul.mubr.f32.gmra.mxu0 %v2504_v4  ;;  %v1798_v4 = vadd.f32 %v2684_v33, %v2676_v9 }
 0x12c   : > { %v1819_v42 = vadd.f32 %v1818_v8, %v1817_v60  ;;  %v2805_v60 = vpop.f32.mrf.mxu1  ;;  %707 = vmatprep.mubr.f32.mxu0 %v2510_v6  ;;  %vm1253_vm1 = vcmp.le.s32.totalorder %v2923_v38, %v2921_v2  ;;  %v2928_v7 = vadd.s32 8, %v2921_v2  ;;  %v2931_v8 = vadd.s32 16, %v2921_v2 }
 0x12d   : > { %v3034_v55 = vadd.s32 112, %v2921_v2 }
 0x12e   : > { %2044 = vmatprep.subr.msk.mxu1 %vm763_vm0, %v1819_v42  ;;  %v2813_v52 = vpop.f32.mrf.mxu1  ;;  %vm1254_vm2 = vcmp.le.s32.totalorder %v2923_v38, %v2928_v7  ;;  %vm1255_vm3 = vcmp.le.s32.totalorder %v2923_v38, %v2931_v8 }
 0x12f   : > { %2045 = vmatpush3.xpose.msk.msra.mxu1 %vm763_vm0, %v1819_v42  ;;  %708 = vmatmul.mubr.f32.gmra.mxu0 %v2524_v10  ;;  %v1795_v10 = vadd.f32 %v2668_v5, %v2657_v63  ;;  %vm1267_vm15 = vcmp.le.s32.totalorder %v2923_v38, %v3034_v55 }
 0x130   : > { %2046 = vmatprep.subr.msk.mxu1 %vm763_vm0, %v1816_v35  ;;  %v2821_v58 = vpop.f32.mrf.mxu1  ;;  %712 = vmatprep.mubr.f32.mxu0 %v2530_v12 }
 0x132   : > { %v2829_v0 = vpop.f32.mrf.mxu1 }
 0x133   : > { %2047 = vmatpush3.xpose.msk.msra.mxu1 %vm763_vm0, %v1816_v35  ;;  %713 = vmatmul.mubr.f32.gmra.mxu0 %v2535_v14 }
 0x134   : > { %2048 = vmatprep.subr.msk.mxu1 %vm763_vm0, %v1813_v57  ;;  %717 = vmatprep.mubr.f32.mxu0 %v2539_v15  ;;  %v1876_v6 = vpop.f32.mrf.mxu1 }
 0x136   : > { %v1877_v12 = vpop.f32.mrf.mxu1 }
 0x137   : > { %2049 = vmatpush3.xpose.msk.msra.mxu1 %vm763_vm0, %v1813_v57  ;;  %718 = vmatmul.mubr.f32.gmra.mxu0 %v2545_v16 }
 0x138   : > { %2050 = vmatprep.subr.msk.mxu1 %vm763_vm0, %v1810_v46  ;;  %722 = vmatprep.mubr.f32.mxu0 %v2549_v17  ;;  %v1879_v14 = vpop.f32.mrf.mxu1 }
 0x13a   : > { %v1880_v15 = vpop.f32.mrf.mxu1 }
 0x13b   : > { %2051 = vmatpush3.xpose.msk.msra.mxu1 %vm763_vm0, %v1810_v46  ;;  %723 = vmatmul.mubr.f32.gmra.mxu0 %v2555_v18  ;;  %v1881_v63 = vadd.f32 %v1880_v15, %v1879_v14 }
 0x13c   : > { %2052 = vmatprep.subr.msk.mxu1 %vm763_vm0, %v1807_v50  ;;  %727 = vmatprep.mubr.f32.mxu0 %v2559_v19  ;;  %v1882_v16 = vpop.f32.mrf.mxu1 }
 0x13e   : > { %v1883_v17 = vpop.f32.mrf.mxu1 }
 0x13f   : > { %2053 = vmatpush3.xpose.msk.msra.mxu1 %vm763_vm0, %v1807_v50  ;;  %728 = vmatmul.mubr.f32.gmra.mxu0 %v2565_v20  ;;  %v1884_v5 = vadd.f32 %v1883_v17, %v1882_v16  ;;  %v2944_v50 = vadd.s32 32, %v2921_v2 }
 0x140   : > { %2054 = vmatprep.subr.msk.mxu1 %vm763_vm0, %v1804_v56  ;;  %732 = vmatprep.mubr.f32.mxu0 %v2569_v21  ;;  %v1885_v18 = vpop.f32.mrf.mxu1 }
 0x141   : > { %vm1257_vm5 = vcmp.le.s32.totalorder %v2923_v38, %v2944_v50 }
 0x142   : > { %v1886_v19 = vpop.f32.mrf.mxu1 }
 0x143   : > { %2055 = vmatpush3.xpose.msk.msra.mxu1 %vm763_vm0, %v1804_v56  ;;  %733 = vmatmul.mubr.f32.gmra.mxu0 %v2575_v22  ;;  %v3347_v22 = vld [vmem:[#allocation4_spill] sm:$0xff]  ;;  %v1887_v33 = vadd.f32 %v1886_v19, %v1885_v18 }
 0x144   : > { %2056 = vmatprep.subr.msk.mxu1 %vm763_vm0, %v1801_v62  ;;  %737 = vmatprep.mubr.f32.mxu0 %v2579_v23  ;;  %v1888_v20 = vpop.f32.mrf.mxu1  ;;  %v3348_v23 = vld [vmem:[#allocation5_spill] sm:$0xff] }
 0x146   : > { %v1889_v21 = vpop.f32.mrf.mxu1 }
 0x147   : > { %2057 = vmatpush3.xpose.msk.msra.mxu1 %vm763_vm0, %v1801_v62  ;;  %738 = vmatmul.mubr.f32.gmra.mxu0 %v2585_v24  ;;  %v1857_v24 = vadd.f32 %v3348_v23, %v3347_v22  ;;  %v1890_v35 = vadd.f32 %v1889_v21, %v1888_v20  ;;  %v2977_v21 = vadd.s32 56, %v2921_v2  ;;  %v2980_v22 = vadd.s32 64, %v2921_v2 }
 0x148   : > { %2058 = vmatprep.subr.msk.mxu1 %vm763_vm0, %v1798_v4  ;;  %742 = vmatprep.mubr.f32.mxu0 %v2589_v25  ;;  %v3349_v25 = vld [vmem:[#allocation6_spill] sm:$0xff] }
 0x149   : > { %vm1260_vm8 = vcmp.le.s32.totalorder %v2923_v38, %v2977_v21  ;;  %vm1261_vm9 = vcmp.le.s32.totalorder %v2923_v38, %v2980_v22 }
 0x14b   : > { %2059 = vmatpush3.xpose.msk.msra.mxu1 %vm763_vm0, %v1798_v4  ;;  %743 = vmatmul.mubr.f32.gmra.mxu0 %v2595_v26  ;;  %v3350_v26 = vld [vmem:[#allocation7_spill] sm:$0xff] }
 0x14c   : > { %2060 = vmatprep.subr.msk.mxu1 %vm763_vm0, %v1795_v10  ;;  %747 = vmatprep.mubr.f32.mxu0 %v2599_v27  ;;  %v1860_v27 = vadd.f32 %v3350_v26, %v3349_v25  ;;  %3356 = vst [vmem:[#allocation7_spill] sm:$0xff] %v3034_v55 }
 0x14f   : > { %2061 = vmatpush3.xpose.msk.msra.mxu1 %vm763_vm0, %v1795_v10  ;;  %748 = vmatmul.mubr.f32.gmra.mxu0 %v2605_v28  ;;  %v1891_v28 = vpop.f32.mrf.mxu1  ;;  %v2959_v10 = vadd.s32 40, %v2921_v2 }
 0x150   : > { %2062 = vmatprep.subr.msk.mxu1 %vm763_vm0, %v2655_v61  ;;  %752 = vmatprep.mubr.f32.mxu0 %v2609_v29  ;;  %v3351_v29 = vld [vmem:[#allocation8_spill] sm:$0xff] }
 0x151   : > { %vm1258_vm6 = vcmp.le.s32.totalorder %v2923_v38, %v2959_v10 }
 0x153   : > { %2063 = vmatpush3.xpose.msk.msra.mxu1 %vm763_vm0, %v2655_v61  ;;  %753 = vmatmul.mubr.f32.gmra.mxu0 %v2615_v30  ;;  %v3352_v30 = vld [vmem:[#allocation9_spill] sm:$0xff] }
 0x154   : > { %2064 = vmatprep.subr.msk.mxu1 %vm763_vm0, %v2652_v54  ;;  %757 = vmatprep.mubr.f32.mxu0 %v2619_v31  ;;  %v1863_v31 = vadd.f32 %v3352_v30, %v3351_v29  ;;  %v2993_v30 = vadd.s32 72, %v2921_v2 }
 0x156   : > { %vm1262_vm10 = vcmp.le.s32.totalorder %v2923_v38, %v2993_v30 }
 0x157   : > { %2065 = vmatpush3.xpose.msk.msra.mxu1 %vm763_vm0, %v2652_v54  ;;  %758 = vmatmul.mubr.f32.gmra.mxu0 %v2625_v32  ;;  %v1866_v32 = vadd.f32 %v2787_v47, %v2782_v13  ;;  %v1878_v54 = vadd.f32 %v1877_v12, %v1876_v6  ;;  %v2962_v12 = vadd.s32 48, %v2921_v2 }
 0x158   : > { %2066 = vmatprep.subr.msk.mxu1 %vm763_vm0, %v2650_v48 }
 0x159   : > { %vm1259_vm7 = vcmp.le.s32.totalorder %v2923_v38, %v2962_v12 }
 0x15b   : > { %2067 = vmatpush3.xpose.msk.msra.mxu1 %vm763_vm0, %v2650_v48  ;;  %v1875_v48 = vadd.f32 %v2829_v0, %v2821_v58 }
 0x15c   : > { %2068 = vmatprep.subr.msk.mxu1 %vm763_vm0, %v2648_v43 }
 0x15f   : > { %2069 = vmatpush3.xpose.msk.msra.mxu1 %vm763_vm0, %v2648_v43 }
 0x160   : > { %2070 = vmatprep.subr.msk.mxu1 %vm763_vm0, %v2646_v40 }
 0x163   : > { %2071 = vmatpush3.xpose.msk.msra.mxu1 %vm763_vm0, %v2646_v40  ;;  %v1872_v40 = vadd.f32 %v2813_v52, %v2805_v60  ;;  %v2941_v60 = vadd.s32 24, %v2921_v2 }
 0x164   : > { %2072 = vmatprep.subr.msk.mxu1 %vm763_vm0, %v2644_v37 }
 0x165   : > { %vm1256_vm4 = vcmp.le.s32.totalorder %v2923_v38, %v2941_v60 }
 0x167   : > { %2073 = vmatpush3.xpose.msk.msra.mxu1 %vm763_vm0, %v2644_v37  ;;  %v1869_v37 = vadd.f32 %v2799_v44, %v2793_v49 }
 0x168   : > { %2074 = vmatprep.subr.msk.mxu1 %vm763_vm0, %v2642_v34 }
 0x16b   : > { %2075 = vmatpush3.xpose.msk.msra.mxu1 %vm763_vm0, %v2642_v34  ;;  %v1892_v34 = vpop.f32.mrf.mxu1 }
 0x16c   : > { %v1893_v47 = vadd.f32 %v1892_v34, %v1891_v28 }
 0x16d   : > { %v1894_v43 = vpop.f32.mrf.mxu1 }
 0x16e   : > { %2077 = vmatmul.mubr.msk.f32.vlgmr.msra.gmra.mxu1 %vm763_vm0, %v1857_v24 }
 0x16f   : > { %2079 = vmatprep.mubr.msk.f32.mxu1 %vm763_vm0, %v1860_v27  ;;  %v1895_v61 = vpop.f32.mrf.mxu1 }
 0x170   : > { %v1896_v39 = vadd.f32 %v1895_v61, %v1894_v43 }
 0x171   : > { %v1897_v9 = vpop.f32.mrf.mxu1 }
 0x172   : > { %2080 = vmatmul.mubr.msk.f32.gmra.mxu1 %vm763_vm0, %v1863_v31  ;;  %v2996_v31 = vadd.s32 80, %v2921_v2 }
 0x173   : > { %2082 = vmatprep.mubr.msk.f32.mxu1 %vm763_vm0, %v1866_v32  ;;  %v1898_v45 = vpop.f32.mrf.mxu1 }
 0x174   : > { %v1899_v53 = vadd.f32 %v1898_v45, %v1897_v9  ;;  %vm1263_vm11 = vcmp.le.s32.totalorder %v2923_v38, %v2996_v31  ;;  %v3014_v9 = vadd.s32 96, %v2921_v2 }
 0x176   : > { %2083 = vmatmul.mubr.msk.f32.gmra.mxu1 %vm763_vm0, %v1869_v37  ;;  %3354 = vst [vmem:[#allocation5_spill] sm:$0xff] %v3014_v9  ;;  %vm1265_vm13 = vcmp.le.s32.totalorder %v2923_v38, %v3014_v9 }
 0x177   : > { %2085 = vmatprep.mubr.msk.f32.mxu1 %vm763_vm0, %v1872_v40 }
 0x17a   : > { %2086 = vmatmul.mubr.msk.f32.gmra.mxu1 %vm763_vm0, %v1875_v48 }
 0x17b   : > { %2088 = vmatprep.mubr.msk.f32.mxu1 %vm763_vm0, %v1878_v54 }
 0x17e   : > { %2089 = vmatmul.mubr.msk.f32.gmra.mxu1 %vm763_vm0, %v1881_v63 }
 0x17f   : > { %2091 = vmatprep.mubr.msk.f32.mxu1 %vm763_vm0, %v1884_v5  ;;  %v3011_v5 = vadd.s32 88, %v2921_v2 }
 0x181   : > { %3353 = vst [vmem:[#allocation4_spill] sm:$0xff] %v3011_v5  ;;  %vm1264_vm12 = vcmp.le.s32.totalorder %v2923_v38, %v3011_v5 }
 0x182   : > { %2092 = vmatmul.mubr.msk.f32.gmra.mxu1 %vm763_vm0, %v1887_v33 }
 0x183   : > { %2094 = vmatprep.mubr.msk.f32.mxu1 %vm763_vm0, %v1890_v35 }
 0x186   : > { %2095 = vmatmul.mubr.msk.f32.gmra.mxu1 %vm763_vm0, %v1893_v47 }
 0x187   : > { %2097 = vmatprep.mubr.msk.f32.mxu1 %vm763_vm0, %v1896_v39 }
 0x18a   : > { %2098 = vmatmul.mubr.msk.f32.gmra.mxu1 %vm763_vm0, %v1899_v53 }
 0x1db   : > { %v1932_v59 = vpop.f32.mrf.mxu0 }
 0x1dd   : > { %v1933_v3 = vpop.f32.mrf.mxu0 }
 0x1de   : > { %v2917_v11 = vadd.f32 %v1933_v3, %v1932_v59 }
 0x1df   : > { %v1935_v13 = vpop.f32.mrf.mxu0 }
 0x1e1   : > { %v1936_v41 = vpop.f32.mrf.mxu0 }
 0x1e2   : > { %v2919_v51 = vadd.f32 %v1936_v41, %v1935_v13  ;;  %v3031_v41 = vadd.s32 104, %v2921_v2 }
 0x1e3   : > { %v2946_v58 = vpop.f32.mrf.mxu0 }
 0x1e4   : > { %3355 = vst [vmem:[#allocation6_spill] sm:$0xff] %v3031_v41  ;;  %vm1266_vm14 = vcmp.le.s32.totalorder %v2923_v38, %v3031_v41 }
 0x1e5   : > { %v2964_v16 = vpop.f32.mrf.mxu0 }
 0x1e7   : > { %v1941_v25 = vpop.f32.mrf.mxu0 }
 0x1e9   : > { %v1942_v32 = vpop.f32.mrf.mxu0 }
 0x1ea   : > { %v2998_v40 = vadd.f32 %v1942_v32, %v1941_v25 }
 0x1eb   : > { %v1944_v61 = vpop.f32.mrf.mxu0 }
 0x1ed   : > { %v1945_v35 = vpop.f32.mrf.mxu0 }
 0x1ee   : > { %v3020_v59 = vadd.f32 %v1945_v35, %v1944_v61 }
 0x1ef   : > { %v3022_v3 = vpop.f32.mrf.mxu0 }
 0x22e   : > { %v2078_v36 = vpop.f32.mrf.mxu1 }
 0x22f   : > { %v1006_v57 = vmul.f32 0.0625, %v2078_v36 }
 0x230   : > { %v926_v1 = vpop.f32.mrf.mxu1 }
 0x231   : > { %v1005_v42 = vmul.f32 0.0625, %v926_v1  ;;  %v2948_v0 = vsel %vm1254_vm2, %v1006_v57, -inf  ;;  %v3036_v1 = vpop.f32.mrf.mxu0 }
 0x232   : > { %v2081_v49 = vpop.f32.mrf.mxu1 }
 0x233   : > { %v2933_v44 = vsel %vm1253_vm1, %v1005_v42, -inf  ;;  %v1008_v62 = vmul.f32 0.0625, %v2081_v49 }
 0x234   : > { %1285 = vmax.xlane.f32.xlu0 %v2933_v44  ;;  %v936_v46 = vpop.f32.mrf.mxu1 }
 0x235   : > { %v1007_v52 = vmul.f32 0.0625, %v936_v46  ;;  %v2966_v18 = vsel %vm1256_vm4, %v1008_v62, -inf  ;;  %v3049_v62 = vadd.s32 120, %v2921_v2 }
 0x236   : > { %v2084_v56 = vpop.f32.mrf.mxu1 }
 0x237   : > { %v2950_v4 = vsel %vm1255_vm3, %v1007_v52, -inf  ;;  %v1010_v17 = vmul.f32 0.0625, %v2084_v56  ;;  %v1950_v52 = vpop.f32.mrf.mxu0  ;;  %3357 = vst [vmem:[#allocation8_spill] sm:$0xff] %v3049_v62  ;;  %vm1268_vm1 = vcmp.le.s32.totalorder %v2923_v38, %v3049_v62 }
 0x238   : > { %1287 = vmax.xlane.f32.xlu0 %v2948_v0  ;;  %1289 = vmax.xlane.f32.xlu1 %v2950_v4  ;;  %v946_v6 = vpop.f32.mrf.mxu1 }
 0x239   : > { %v1009_v14 = vmul.f32 0.0625, %v946_v6  ;;  %v2982_v27 = vsel %vm1258_vm6, %v1010_v17, -inf }
 0x23a   : > { %v2087_v15 = vpop.f32.mrf.mxu1 }
 0x23b   : > { %v2968_v19 = vsel %vm1257_vm5, %v1009_v14, -inf  ;;  %v1012_v26 = vmul.f32 0.0625, %v2087_v15  ;;  %v1951_v14 = vpop.f32.mrf.mxu0 }
 0x23c   : > { %1291 = vmax.xlane.f32.xlu1 %v2966_v18  ;;  %1293 = vmax.xlane.f32.xlu0 %v2968_v19  ;;  %v956_v20 = vpop.f32.mrf.mxu1 }
 0x23d   : > { %v1011_v23 = vmul.f32 0.0625, %v956_v20  ;;  %v3000_v48 = vsel %vm1260_vm8, %v1012_v26, -inf }
 0x23e   : > { %v2090_v24 = vpop.f32.mrf.mxu1 }
 0x23f   : > { %v2984_v28 = vsel %vm1259_vm7, %v1011_v23, -inf  ;;  %v1014_v43 = vmul.f32 0.0625, %v2090_v24  ;;  %v1953_v23 = vpop.f32.mrf.mxu0 }
 0x240   : > { %1295 = vmax.xlane.f32.xlu1 %v2982_v27  ;;  %1297 = vmax.xlane.f32.xlu0 %v2984_v28  ;;  %v966_v29 = vpop.f32.mrf.mxu1 }
 0x241   : > { %v1013_v34 = vmul.f32 0.0625, %v966_v29  ;;  %v3016_v47 = vsel %vm1262_vm10, %v1014_v43, -inf  ;;  %v1954_v24 = vpop.f32.mrf.mxu0 }
 0x242   : > { %v2093_v37 = vpop.f32.mrf.mxu1 }
 0x243   : > { %v3002_v54 = vsel %vm1261_vm9, %v1013_v34, -inf  ;;  %v1016_v45 = vmul.f32 0.0625, %v2093_v37  ;;  %v1956_v26 = vpop.f32.mrf.mxu0 }
 0x244   : > { %1299 = vmax.xlane.f32.xlu1 %v3000_v48  ;;  %1301 = vmax.xlane.f32.xlu0 %v3002_v54  ;;  %v976_v63 = vpop.f32.mrf.mxu1 }
 0x245   : > { %v1015_v33 = vmul.f32 0.0625, %v976_v63  ;;  %v3038_v57 = vsel %vm1264_vm12, %v1016_v45, -inf  ;;  %v1957_v29 = vpop.f32.mrf.mxu0 }
 0x246   : > { %v2096_v39 = vpop.f32.mrf.mxu1  ;;  %v1958_v5 = vadd.f32 %v1957_v29, %v1956_v26 }
 0x247   : > { %v3018_v53 = vsel %vm1263_vm11, %v1015_v33, -inf  ;;  %v1018_v49 = vmul.f32 0.0625, %v2096_v39  ;;  %v1959_v32 = vpop.f32.mrf.mxu0 }
 0x248   : > { %1303 = vmax.xlane.f32.xlu1 %v3016_v47  ;;  %1305 = vmax.xlane.f32.xlu0 %v3018_v53  ;;  %v986_v13 = vpop.f32.mrf.mxu1 }
 0x249   : > { %v1017_v36 = vmul.f32 0.0625, %v986_v13  ;;  %v3051_v17 = vsel %vm1266_vm14, %v1018_v49, -inf  ;;  %v1960_v34 = vpop.f32.mrf.mxu0 }
 0x24a   : > { %v2099_v42 = vpop.f32.mrf.mxu1  ;;  %v1961_v9 = vadd.f32 %v1960_v34, %v1959_v32 }
 0x24b   : > { %v3040_v46 = vsel %vm1265_vm13, %v1017_v36, -inf  ;;  %v1020_v15 = vmul.f32 0.0625, %v2099_v42  ;;  %v1962_v37 = vpop.f32.mrf.mxu0 }
 0x24c   : > { %1307 = vmax.xlane.f32.xlu1 %v3038_v57  ;;  %1309 = vmax.xlane.f32.xlu0 %v3040_v46  ;;  %v996_v56 = vpop.f32.mrf.mxu1 }
 0x24d   : > { %v1019_v6 = vmul.f32 0.0625, %v996_v56  ;;  %v3059_v25 = vsel %vm1268_vm1, %v1020_v15, -inf  ;;  %v1963_v43 = vpop.f32.mrf.mxu0 }
 0x24e   : > { %v1964_v41 = vadd.f32 %v1963_v43, %v1962_v37 }
 0x24f   : > { %v3053_v20 = vsel %vm1267_vm15, %v1019_v6, -inf  ;;  %v1965_v61 = vpop.f32.mrf.mxu0 }
 0x250   : > { %1311 = vmax.xlane.f32.xlu1 %v3051_v17  ;;  %1313 = vmax.xlane.f32.xlu0 %v3053_v20 }
 0x251   : > { %v1966_v63 = vpop.f32.mrf.mxu0 }
 0x252   : > { %v1967_v55 = vadd.f32 %v1966_v63, %v1965_v61  ;;  %v1949_v61 = vadd.f32 %v3036_v1, %v3022_v3 }
 0x253   : > { %v1968_v33 = vpop.f32.mrf.mxu0 }
 0x254   : > { %1315 = vmax.xlane.f32.xlu1 %v3059_v25 }
 0x255   : > { %v1969_v35 = vpop.f32.mrf.mxu0 }
 0x256   : > { %v1970_v62 = vadd.f32 %v1969_v35, %v1968_v33 }
 0x257   : > { %v1971_v39 = vpop.f32.mrf.mxu0 }
 0x259   : > { %v1972_v45 = vpop.f32.mrf.mxu0 }
 0x25a   : > { %v1973_v15 = vadd.f32 %v1972_v45, %v1971_v39  ;;  %v1952_v39 = vadd.f32 %v1951_v14, %v1950_v52 }
 0x25b   : > { %v1974_v13 = vpop.f32.mrf.mxu0 }
 0x25d   : > { %v1975_v36 = vpop.f32.mrf.mxu0 }
 0x25e   : > { %v1976_v56 = vadd.f32 %v1975_v36, %v1974_v13  ;;  %v1955_v13 = vadd.f32 %v1954_v24, %v1953_v23 }
 0x25f   : > { %v1977_v42 = vpop.f32.mrf.mxu0 }
 0x261   : > { %v1978_v49 = vpop.f32.mrf.mxu0 }
 0x262   : > { %v1979_v6 = vadd.f32 %v1978_v49, %v1977_v42 }
 0x264   : > { %2100 = vmatprep.subr.mxu1 %v1979_v6 }
 0x265   : > { %2101 = vmatpush3.msra.mxu1 %v1979_v6 }
 0x266   : > { %2102 = vmatprep.subr.mxu1 %v1976_v56 }
 0x267   : > { %2103 = vmatpush3.msra.mxu1 %v1976_v56 }
 0x268   : > { %2104 = vmatprep.subr.mxu1 %v1973_v15 }
 0x269   : > { %2105 = vmatpush3.msra.mxu1 %v1973_v15 }
 0x26a   : > { %2106 = vmatprep.subr.mxu1 %v1970_v62 }
 0x26b   : > { %2107 = vmatpush3.msra.mxu1 %v1970_v62 }
 0x26c   : > { %2108 = vmatprep.subr.mxu1 %v1967_v55 }
 0x26d   : > { %2109 = vmatpush3.msra.mxu1 %v1967_v55  ;;  %v1940_v55 = vadd.f32 %v2964_v16, %v2946_v58 }
 0x26e   : > { %2110 = vmatprep.subr.mxu1 %v1964_v41 }
 0x26f   : > { %2111 = vmatpush3.msra.mxu1 %v1964_v41 }
 0x270   : > { %2112 = vmatprep.subr.mxu1 %v1961_v9 }
 0x271   : > { %2113 = vmatpush3.msra.mxu1 %v1961_v9 }
 0x272   : > { %2114 = vmatprep.subr.mxu1 %v1958_v5 }
 0x273   : > { %2115 = vmatpush3.msra.mxu1 %v1958_v5 }
 0x274   : > { %2116 = vmatprep.subr.mxu1 %v1955_v13 }
 0x275   : > { %2117 = vmatpush3.msra.mxu1 %v1955_v13 }
 0x276   : > { %2118 = vmatprep.subr.mxu1 %v1952_v39 }
 0x277   : > { %2119 = vmatpush3.msra.mxu1 %v1952_v39 }
 0x278   : > { %2120 = vmatprep.subr.mxu1 %v1949_v61 }
 0x279   : > { %2121 = vmatpush3.msra.mxu1 %v1949_v61 }
 0x27a   : > { %2122 = vmatprep.subr.mxu1 %v3020_v59 }
 0x27b   : > { %2123 = vmatpush3.msra.mxu1 %v3020_v59 }
 0x27c   : > { %2124 = vmatprep.subr.mxu1 %v2998_v40 }
 0x27d   : > { %2125 = vmatpush3.msra.mxu1 %v2998_v40 }
 0x27e   : > { %2126 = vmatprep.subr.mxu1 %v1940_v55 }
 0x27f   : > { %2127 = vmatpush3.msra.mxu1 %v1940_v55 }
 0x280   : > { %2128 = vmatprep.subr.mxu1 %v2919_v51 }
 0x281   : > { %2129 = vmatpush3.msra.mxu1 %v2919_v51 }
 0x282   : > { %2130 = vmatprep.subr.mxu1 %v2917_v11 }
 0x283   : > { %2131 = vmatpush3.msra.mxu1 %v2917_v11 }
 0x2bd   : > { %v1286_v5 = vpop.xlane.xlu0 %1285 }
 0x2be   : > { %v1317_v58 = vsub.f32 %v2933_v44, %v1286_v5 }
 0x2c0   : > { %v1333_v16 = vmul.f32 1.442695, %v1317_v58 }
 0x2c1   : > { %v1288_v9 = vpop.xlane.xlu0 %1287  ;;  %v1290_v59 = vpop.xlane.xlu1 %1289 }
 0x2c2   : > { %2164 = vpow2.f32 %v1333_v16  ;;  %v1318_v3 = vsub.f32 %v2948_v0, %v1288_v9  ;;  %v1319_v40 = vsub.f32 %v2950_v4, %v1290_v59 }
 0x2c4   : > { %v1335_v41 = vmul.f32 1.442695, %v1318_v3  ;;  %v1337_v1 = vmul.f32 1.442695, %v1319_v40 }
 0x2c5   : > { %v1292_v52 = vpop.xlane.xlu1 %1291  ;;  %v1294_v62 = vpop.xlane.xlu0 %1293 }
 0x2c6   : > { %2166 = vpow2.f32 %v1335_v41  ;;  %v1320_v51 = vsub.f32 %v2966_v18, %v1292_v52  ;;  %v1321_v11 = vsub.f32 %v2968_v19, %v1294_v62 }
 0x2c7   : > { %2168 = vpow2.f32 %v1337_v1 }
 0x2c8   : > { %v1339_v14 = vmul.f32 1.442695, %v1320_v51  ;;  %v1341_v44 = vmul.f32 1.442695, %v1321_v11  ;;  %v1044_v11 = vmul.u32 128, %v2921_v2 }
 0x2c9   : > { %v1296_v23 = vpop.xlane.xlu1 %1295  ;;  %v1298_v24 = vpop.xlane.xlu0 %1297 }
 0x2ca   : > { %2170 = vpow2.f32 %v1339_v14  ;;  %v1322_v26 = vsub.f32 %v2982_v27, %v1296_v23  ;;  %v1323_v0 = vsub.f32 %v2984_v28, %v1298_v24  ;;  %v3140_v14 = vstv %s1719_s16 }
 0x2cb   : > { %2172 = vpow2.f32 %v1341_v44  ;;  %v1045_v44 = vmul.u32 128, %v2928_v7  ;;  %v1046_v23 = vmul.u32 128, %v2931_v8  ;;  %v1061_v24 = vadd.s32 %v3140_v14, %v1044_v11 }
 0x2cc   : > { %v1343_v4 = vmul.f32 1.442695, %v1322_v26  ;;  %v1345_v29 = vmul.f32 1.442695, %v1323_v0  ;;  %v1054_v11 = vmul.u32 128, %v2996_v31 }
 0x2cd   : > { %v1300_v32 = vpop.xlane.xlu1 %1299  ;;  %v1302_v34 = vpop.xlane.xlu0 %1301  ;;  %v1062_v26 = vadd.s32 %v3140_v14, %v1045_v44  ;;  %v1063_v0 = vadd.s32 %v3140_v14, %v1046_v23 }
 0x2ce   : > { %2174 = vpow2.f32 %v1343_v4  ;;  %v1324_v18 = vsub.f32 %v3000_v48, %v1300_v32  ;;  %v1325_v19 = vsub.f32 %v3002_v54, %v1302_v34  ;;  %v1047_v4 = vmul.u32 128, %v2941_v60 }
 0x2cf   : > { %v3083_v37 = vpop.eup %2164  ;;  %2176 = vpow2.f32 %v1345_v29  ;;  %v1048_v29 = vmul.u32 128, %v2944_v50  ;;  %v1077_v32 = vadd.s32 %v1061_v24, %v2923_v38  ;;  %v1078_v2 = vadd.s32 %v1062_v26, %v2923_v38  ;;  %v3358_v24 = vld [vmem:[#allocation4_spill] sm:$0xff] }
 0x2d0   : > { %v1347_v43 = vmul.f32 1.442695, %v1324_v18  ;;  %v1349_v63 = vmul.f32 1.442695, %v1325_v19  ;;  %1365 = vadd.xlane.f32.xlu0 %v3083_v37  ;;  %v1079_v34 = vadd.s32 %v1063_v0, %v2923_v38  ;;  %v1064_v7 = vadd.s32 %v3140_v14, %v1047_v4 }
 0x2d1   : > { %v1304_v27 = vpop.xlane.xlu1 %1303  ;;  %v1306_v33 = vpop.xlane.xlu0 %1305  ;;  %v1065_v8 = vadd.s32 %v3140_v14, %v1048_v29  ;;  %v1093_v18 = vshrl.u32 %v1077_v32, 16  ;;  %v1049_v19 = vmul.u32 128, %v2959_v10  ;;  %v1055_v26 = vmul.u32 128, %v3358_v24 }
 0x2d2   : > { %2178 = vpow2.f32 %v1347_v43  ;;  %v1326_v28 = vsub.f32 %v3016_v47, %v1304_v27  ;;  %v1327_v35 = vsub.f32 %v3018_v53, %v1306_v33  ;;  %v1050_v43 = vmul.u32 128, %v2962_v12 }
 0x2d3   : > { %v3088_v45 = vpop.eup %2166  ;;  %2180 = vpow2.f32 %v1349_v63  ;;  %v1094_v63 = vshrl.u32 %v1078_v2, 16  ;;  %v1080_v60 = vadd.s32 %v1064_v7, %v2923_v38  ;;  %v1095_v27 = vshrl.u32 %v1079_v34, 16 }
 0x2d4   : > { %v3090_v48 = vpop.eup %2168  ;;  %v1351_v54 = vmul.f32 1.442695, %v1326_v28  ;;  %v1353_v36 = vmul.f32 1.442695, %v1327_v35  ;;  %1367 = vadd.xlane.f32.xlu1 %v3088_v45  ;;  %v1081_v50 = vadd.s32 %v1065_v8, %v2923_v38  ;;  %v1109_v33 = vxor.u32 %v1093_v18, %v1077_v32  ;;  %v3359_v8 = vld [vmem:[#allocation5_spill] sm:$0xff]  ;;  %v3360_v18 = vld [vmem:[#allocation6_spill] sm:$0xff] }
 0x2d5   : > { %1369 = vadd.xlane.f32.xlu0 %v3090_v48  ;;  %v1308_v42 = vpop.xlane.xlu1 %1307  ;;  %v1310_v49 = vpop.xlane.xlu0 %1309  ;;  %v1066_v28 = vadd.s32 %v3140_v14, %v1049_v19  ;;  %v1067_v35 = vadd.s32 %v3140_v14, %v1050_v43  ;;  %v1071_v7 = vadd.s32 %v3140_v14, %v1054_v11  ;;  %v1056_v31 = vmul.u32 128, %v3359_v8 }
 0x2d6   : > { %2182 = vpow2.f32 %v1351_v54  ;;  %v1328_v56 = vsub.f32 %v3038_v57, %v1308_v42  ;;  %v1329_v47 = vsub.f32 %v3040_v46, %v1310_v49  ;;  %v1110_v54 = vxor.u32 %v1094_v63, %v1078_v2 }
 0x2d7   : > { %v3096_v6 = vpop.eup %2170  ;;  %2184 = vpow2.f32 %v1353_v36  ;;  %v1111_v36 = vxor.u32 %v1095_v27, %v1079_v34  ;;  %v1096_v42 = vshrl.u32 %v1080_v60, 16  ;;  %v1125_v49 = vmul.u32 2146121005, %v1109_v33  ;;  %v3361_v27 = vld [vmem:[#allocation7_spill] sm:$0xff] }
 0x2d8   : > { %v3098_v53 = vpop.eup %2172  ;;  %v1355_v15 = vmul.f32 1.442695, %v1328_v56  ;;  %v1357_v13 = vmul.f32 1.442695, %v1329_v47  ;;  %1371 = vadd.xlane.f32.xlu1 %v3096_v6  ;;  %v1097_v56 = vshrl.u32 %v1081_v50, 16  ;;  %v1082_v10 = vadd.s32 %v1066_v28, %v2923_v38 }
 0x2d9   : > { %1373 = vadd.xlane.f32.xlu0 %v3098_v53  ;;  %v1312_v39 = vpop.xlane.xlu1 %1311  ;;  %v1314_v61 = vpop.xlane.xlu0 %1313  ;;  %v1083_v12 = vadd.s32 %v1067_v35, %v2923_v38  ;;  %v1051_v47 = vmul.u32 128, %v2977_v21  ;;  %v1057_v19 = vmul.u32 128, %v3360_v18 }
 0x2da   : > { %2186 = vpow2.f32 %v1355_v15  ;;  %v1330_v55 = vsub.f32 %v3051_v17, %v1312_v39  ;;  %v1331_v57 = vsub.f32 %v3053_v20, %v1314_v61  ;;  %v1126_v15 = vmul.u32 2146121005, %v1110_v54 }
 0x2db   : > { %v3104_v5 = vpop.eup %2174  ;;  %2188 = vpow2.f32 %v1357_v13  ;;  %v1052_v13 = vmul.u32 128, %v2980_v22  ;;  %v1127_v39 = vmul.u32 2146121005, %v1111_v36  ;;  %v1112_v61 = vxor.u32 %v1096_v42, %v1080_v60 }
 0x2dc   : > { %v3106_v46 = vpop.eup %2176  ;;  %v1359_v58 = vmul.f32 1.442695, %v1330_v55  ;;  %v1361_v16 = vmul.f32 1.442695, %v1331_v57  ;;  %1375 = vadd.xlane.f32.xlu1 %v3104_v5  ;;  %v1141_v55 = vshrl.u32 %v1125_v49, 15  ;;  %v1113_v57 = vxor.u32 %v1097_v56, %v1081_v50 }
 0x2dd   : > { %1377 = vadd.xlane.f32.xlu0 %v3106_v46  ;;  %v1316_v9 = vpop.xlane.xlu1 %1315  ;;  %v1142_v44 = vshrl.u32 %v1126_v15, 15  ;;  %v1143_v23 = vshrl.u32 %v1127_v39, 15  ;;  %v1128_v21 = vmul.u32 2146121005, %v1112_v61  ;;  %v1072_v60 = vadd.s32 %v3140_v14, %v1055_v26 }
 0x2de   : > { %2190 = vpow2.f32 %v1359_v58  ;;  %v1332_v59 = vsub.f32 %v3059_v25, %v1316_v9  ;;  %v1068_v58 = vadd.s32 %v3140_v14, %v1051_v47  ;;  %v1099_v9 = vshrl.u32 %v1083_v12, 16  ;;  %v3362_v47 = vld [vmem:[#allocation8_spill] sm:$0xff] }
 0x2df   : > { %v3111_v3 = vpop.eup %2178  ;;  %2192 = vpow2.f32 %v1361_v16  ;;  %v1098_v16 = vshrl.u32 %v1082_v10, 16  ;;  %v1157_v22 = vxor.u32 %v1141_v55, %v1125_v49  ;;  %v1129_v0 = vmul.u32 2146121005, %v1113_v57 }
 0x2e0   : > { %v3113_v17 = vpop.eup %2180  ;;  %v1363_v20 = vmul.f32 1.442695, %v1332_v59  ;;  %1379 = vadd.xlane.f32.xlu1 %v3111_v3  ;;  %v1069_v59 = vadd.s32 %v3140_v14, %v1052_v13  ;;  %v1084_v4 = vadd.s32 %v1068_v58, %v2923_v38  ;;  %v1115_v32 = vxor.u32 %v1099_v9, %v1083_v12 }
 0x2e1   : > { %1381 = vadd.xlane.f32.xlu0 %v3113_v17  ;;  %v1114_v29 = vxor.u32 %v1098_v16, %v1082_v10  ;;  %v1159_v43 = vxor.u32 %v1143_v23, %v1127_v39  ;;  %v1144_v63 = vshrl.u32 %v1128_v21, 15  ;;  %v1058_v50 = vmul.u32 128, %v3361_v27 }
 0x2e2   : > { %2194 = vpow2.f32 %v1363_v20  ;;  %v1053_v20 = vmul.u32 128, %v2993_v30  ;;  %v1085_v2 = vadd.s32 %v1069_v59, %v2923_v38  ;;  %v1158_v30 = vxor.u32 %v1142_v44, %v1126_v15 }
 0x2e3   : > { %v3117_v40 = vpop.eup %2182  ;;  %v1173_v33 = vmul.u32 2221713035, %v1157_v22  ;;  %v1145_v28 = vshrl.u32 %v1129_v0, 15  ;;  %v1130_v35 = vmul.u32 2146121005, %v1114_v29  ;;  %v1100_v36 = vshrl.u32 %v1084_v4, 16 }
 0x2e4   : > { %v3119_v41 = vpop.eup %2184  ;;  %1383 = vadd.xlane.f32.xlu1 %v3117_v40  ;;  %v1070_v34 = vadd.s32 %v3140_v14, %v1053_v20  ;;  %v1131_v54 = vmul.u32 2146121005, %v1115_v32  ;;  %v1087_v49 = vadd.s32 %v1071_v7, %v2923_v38  ;;  %v1174_v56 = vmul.u32 2221713035, %v1158_v30 }
 0x2e5   : > { %1385 = vadd.xlane.f32.xlu0 %v3119_v41  ;;  %v1101_v10 = vshrl.u32 %v1085_v2, 16  ;;  %v1073_v12 = vadd.s32 %v3140_v14, %v1056_v31  ;;  %v1059_v15 = vmul.u32 128, %v3362_v47  ;;  %v1175_v13 = vmul.u32 2221713035, %v1159_v43 }
 0x2e6   : > { %v1086_v42 = vadd.s32 %v1070_v34, %v2923_v38  ;;  %v1160_v39 = vxor.u32 %v1144_v63, %v1128_v21  ;;  %v1088_v61 = vadd.s32 %v1072_v60, %v2923_v38  ;;  %v1074_v55 = vadd.s32 %v3140_v14, %v1057_v19 }
 0x2e7   : > { %v3123_v25 = vpop.eup %2186  ;;  %v1189_v57 = vshrl.u32 %v1173_v33, 16  ;;  %v1161_v58 = vxor.u32 %v1145_v28, %v1129_v0  ;;  %v1075_v16 = vadd.s32 %v3140_v14, %v1058_v50  ;;  %v1146_v9 = vshrl.u32 %v1130_v35, 15 }
 0x2e8   : > { %v3125_v1 = vpop.eup %2188  ;;  %1387 = vadd.xlane.f32.xlu1 %v3123_v25  ;;  %v1147_v59 = vshrl.u32 %v1131_v54, 15  ;;  %v1116_v20 = vxor.u32 %v1100_v36, %v1084_v4  ;;  %v1190_v11 = vshrl.u32 %v1174_v56, 16  ;;  %v1117_v44 = vxor.u32 %v1101_v10, %v1085_v2 }
 0x2e9   : > { %1389 = vadd.xlane.f32.xlu0 %v3125_v1  ;;  %v1102_v23 = vshrl.u32 %v1086_v42, 16  ;;  %v1103_v24 = vshrl.u32 %v1087_v49, 16  ;;  %v1089_v26 = vadd.s32 %v1073_v12, %v2923_v38  ;;  %v1076_v22 = vadd.s32 %v3140_v14, %v1059_v15 }
 0x2ea   : > { %v1191_v29 = vshrl.u32 %v1175_v13, 16  ;;  %v1176_v32 = vmul.u32 2221713035, %v1160_v39  ;;  %v1090_v34 = vadd.s32 %v1074_v55, %v2923_v38  ;;  %v1205_v0 = vxor.u32 %v1189_v57, %v1173_v33 }
 0x2eb   : > { %v3129_v52 = vpop.eup %2190  ;;  %v1177_v7 = vmul.u32 2221713035, %v1161_v58  ;;  %v1091_v30 = vadd.s32 %v1075_v16, %v2923_v38  ;;  %v1162_v8 = vxor.u32 %v1146_v9, %v1130_v35  ;;  %v1163_v4 = vxor.u32 %v1147_v59, %v1131_v54 }
 0x2ec   : > { %v3131_v62 = vpop.eup %2192  ;;  %1391 = vadd.xlane.f32.xlu1 %v3129_v52  ;;  %v1132_v31 = vmul.u32 2146121005, %v1116_v20  ;;  %v1206_v2 = vxor.u32 %v1190_v11, %v1174_v56  ;;  %v1133_v18 = vmul.u32 2146121005, %v1117_v44  ;;  %v1118_v19 = vxor.u32 %v1102_v23, %v1086_v42 }
 0x2ed   : > { %1393 = vadd.xlane.f32.xlu0 %v3131_v62  ;;  %v1119_v43 = vxor.u32 %v1103_v24, %v1087_v49  ;;  %v1092_v63 = vadd.s32 %v1076_v22, %v2923_v38  ;;  %v1207_v60 = vxor.u32 %v1191_v29, %v1175_v13  ;;  %v1192_v27 = vshrl.u32 %v1176_v32, 16 }
 0x2ee   : > { %v1104_v50 = vshrl.u32 %v1088_v61, 16  ;;  %v1221_v36 = vshrl.u32 %v1205_v0, 1  ;;  %v1193_v33 = vshrl.u32 %v1177_v7, 16  ;;  %v1105_v10 = vshrl.u32 %v1089_v26, 16 }
 0x2ef   : > { %v3135_v51 = vpop.eup %2194  ;;  %v1178_v12 = vmul.u32 2221713035, %v1162_v8  ;;  %v1179_v35 = vmul.u32 2221713035, %v1163_v4  ;;  %v1148_v54 = vshrl.u32 %v1132_v31, 15  ;;  %v1222_v47 = vshrl.u32 %v1206_v2, 1 }
 0x2f0   : > { %1395 = vadd.xlane.f32.xlu1 %v3135_v51  ;;  %v1149_v56 = vshrl.u32 %v1133_v18, 15  ;;  %v1134_v15 = vmul.u32 2146121005, %v1118_v19  ;;  %v1135_v42 = vmul.u32 2146121005, %v1119_v43  ;;  %v1223_v39 = vshrl.u32 %v1207_v60, 1 }
 0x2f1   : > { %v1208_v38 = vxor.u32 %v1192_v27, %v1176_v32  ;;  %v1120_v55 = vxor.u32 %v1104_v50, %v1088_v61  ;;  %v1106_v13 = vshrl.u32 %v1090_v34, 16  ;;  %v1209_v58 = vxor.u32 %v1193_v33, %v1177_v7 }
 0x2f2   : > { %v1121_v16 = vxor.u32 %v1105_v10, %v1089_v26  ;;  %v1107_v9 = vshrl.u32 %v1091_v30, 16  ;;  %v1194_v59 = vshrl.u32 %v1178_v12, 16  ;;  %v1195_v20 = vshrl.u32 %v1179_v35, 16 }
 0x2f3   : > { %v3189_v11 = vxor.u32 %v1148_v54, %v1132_v31  ;;  %vm3191_vm2 = vcmp.ge.s32.totalorder %v1221_v36, 429496729  ;;  %v3195_v23 = vxor.u32 %v1149_v56, %v1133_v18  ;;  %v1150_v24 = vshrl.u32 %v1134_v15, 15 }
 0x2f4   : > { %v1151_v22 = vshrl.u32 %v1135_v42, 15  ;;  %vm3197_vm3 = vcmp.ge.s32.totalorder %v1222_v47, 429496729  ;;  %v1224_v26 = vshrl.u32 %v1208_v38, 1  ;;  %v1136_v29 = vmul.u32 2146121005, %v1120_v55 }
 0x2f5   : > { %v3201_v32 = vxor.u32 %v1106_v13, %v1090_v34  ;;  %v1108_v0 = vshrl.u32 %v1092_v63, 16  ;;  %vm3203_vm4 = vcmp.ge.s32.totalorder %v1223_v39, 429496729  ;;  %v1225_v4 = vshrl.u32 %v1209_v58, 1 }
 0x2f6   : > { %v1137_v31 = vmul.u32 2146121005, %v1121_v16  ;;  %v3207_v2 = vxor.u32 %v1107_v9, %v1091_v30  ;;  %v1210_v19 = vxor.u32 %v1194_v59, %v1178_v12  ;;  %v3209_v43 = vxor.u32 %v1195_v20, %v1179_v35 }
 0x2f7   : > { %v1181_v60 = vmul.u32 2221713035, %v3195_v23  ;;  %v3214_v27 = vxor.u32 %v1150_v24, %v1134_v15  ;;  %v3216_v50 = vxor.u32 %v1151_v22, %v1135_v42  ;;  %vm3218_vm5 = vcmp.ge.s32.totalorder %v1224_v26, 429496729 }
 0x2f8   : > { %v1152_v30 = vshrl.u32 %v1136_v29, 15  ;;  %v1138_v33 = vmul.u32 2146121005, %v3201_v32  ;;  %v3223_v10 = vxor.u32 %v1108_v0, %v1092_v63  ;;  %vm3225_vm6 = vcmp.ge.s32.totalorder %v1225_v4, 429496729 }
 0x2f9   : > { %v1153_v54 = vshrl.u32 %v1137_v31, 15  ;;  %v1139_v47 = vmul.u32 2146121005, %v3207_v2  ;;  %v1226_v15 = vshrl.u32 %v1210_v19, 1  ;;  %v1227_v42 = vshrl.u32 %v3209_v43, 1 }
 0x2fa   : > { %v1197_v38 = vshrl.u32 %v1181_v60, 16  ;;  %v1182_v55 = vmul.u32 2221713035, %v3214_v27  ;;  %v1183_v13 = vmul.u32 2221713035, %v3216_v50  ;;  %v3237_v16 = vxor.u32 %v1152_v30, %v1136_v29 }
 0x2fb   : > { %v1154_v9 = vshrl.u32 %v1138_v33, 15  ;;  %v1140_v59 = vmul.u32 2146121005, %v3223_v10  ;;  %v1155_v44 = vshrl.u32 %v1139_v47, 15  ;;  %vm3242_vm7 = vcmp.ge.s32.totalorder %v1226_v15, 429496729 }
 0x2fc   : > { %v1213_v29 = vxor.u32 %v1197_v38, %v1181_v60  ;;  %v1198_v32 = vshrl.u32 %v1182_v55, 16  ;;  %v1199_v0 = vshrl.u32 %v1183_v13, 16  ;;  %vm3254_vm8 = vcmp.ge.s32.totalorder %v1227_v42, 429496729 }
 0x2fd   : > { %v1170_v2 = vxor.u32 %v1154_v9, %v1138_v33 }
 0x2fe   : > { %v1229_v50 = vshrl.u32 %v1213_v29, 1  ;;  %v1215_v30 = vxor.u32 %v1199_v0, %v1183_v13 }
 0x300   : > { %vm3271_vm10 = vcmp.ge.s32.totalorder %v1229_v50, 429496729  ;;  %v1231_v38 = vshrl.u32 %v1215_v30, 1 }
 0x302   : > { %vm1247_vm12 = vcmp.ge.s32.totalorder %v1231_v38, 429496729 }
 0x359   : > { %v1366_v21 = vpop.xlane.xlu0 %1365 }
 0x35a   : > { %2196 = vrcp.f32 %v1366_v21 }
 0x35d   : > { %v1368_v14 = vpop.xlane.xlu1 %1367 }
 0x35e   : > { %2198 = vrcp.f32 %v1368_v14  ;;  %v1370_v28 = vpop.xlane.xlu0 %1369  ;;  %v1180_v14 = vmul.u32 2221713035, %v3189_v11 }
 0x35f   : > { %2200 = vrcp.f32 %v1370_v28 }
 0x361   : > { %v1372_v49 = vpop.xlane.xlu1 %1371 }
 0x362   : > { %2202 = vrcp.f32 %v1372_v49  ;;  %v1374_v57 = vpop.xlane.xlu0 %1373  ;;  %v1196_v49 = vshrl.u32 %v1180_v14, 16 }
 0x363   : > { %2204 = vrcp.f32 %v1374_v57 }
 0x365   : > { %v1376_v61 = vpop.xlane.xlu1 %1375 }
 0x366   : > { %2206 = vrcp.f32 %v1376_v61  ;;  %v1378_v7 = vpop.xlane.xlu0 %1377  ;;  %v1212_v61 = vxor.u32 %v1196_v49, %v1180_v14  ;;  %v1171_v14 = vxor.u32 %v1155_v44, %v1139_v47 }
 0x367   : > { %v2197_v18 = vpop.eup %2196  ;;  %2208 = vrcp.f32 %v1378_v7 }
 0x368   : > { %v1398_v34 = vmul.f32 %v2197_v18, %v3083_v37  ;;  %v1156_v18 = vshrl.u32 %v1140_v59, 15  ;;  %v1228_v8 = vshrl.u32 %v1212_v61, 1  ;;  %v1187_v36 = vmul.u32 2221713035, %v1171_v14 }
 0x369   : > { %v1380_v28 = vpop.xlane.xlu1 %1379 }
 0x36a   : > { %2210 = vrcp.f32 %v1380_v28  ;;  %v1382_v12 = vpop.xlane.xlu0 %1381  ;;  %v1429_v35 = vmul.f32 1.25, %v1398_v34  ;;  %v1214_v28 = vxor.u32 %v1198_v32, %v1182_v55  ;;  %vm3264_vm9 = vcmp.ge.s32.totalorder %v1228_v8, 429496729 }
 0x36b   : > { %v2199_v56 = vpop.eup %2198  ;;  %2212 = vrcp.f32 %v1382_v12 }
 0x36c   : > { %v2201_v39 = vpop.eup %2200  ;;  %v1400_v63 = vmul.f32 %v2199_v56, %v3088_v45  ;;  %2132 = vmatprep.mubr.msk.f32.mxu1 %vm3191_vm2, %v1429_v35  ;;  %v3240_v45 = vxor.u32 %v1153_v54, %v1137_v31  ;;  %v1184_v31 = vmul.u32 2221713035, %v3237_v16  ;;  %v1186_v35 = vmul.u32 2221713035, %v1170_v2 }
 0x36d   : > { %v1384_v57 = vpop.xlane.xlu1 %1383  ;;  %v1402_v58 = vmul.f32 %v2201_v39, %v3090_v48  ;;  %v1172_v54 = vxor.u32 %v1156_v18, %v1140_v59 }
 0x36e   : > { %v1430_v20 = vmul.f32 1.25, %v1400_v63  ;;  %2214 = vrcp.f32 %v1384_v57  ;;  %v1386_v11 = vpop.xlane.xlu0 %1385  ;;  %v1185_v21 = vmul.u32 2221713035, %v3240_v45  ;;  %v1200_v12 = vshrl.u32 %v1184_v31, 16 }
 0x36f   : > { %v2203_v23 = vpop.eup %2202  ;;  %2216 = vrcp.f32 %v1386_v11  ;;  %v1431_v24 = vmul.f32 1.25, %v1402_v58  ;;  %v1230_v63 = vshrl.u32 %v1214_v28, 1  ;;  %v1202_v58 = vshrl.u32 %v1186_v35, 16 }
 0x370   : > { %v2205_v48 = vpop.eup %2204  ;;  %2133 = vmatmul.mubr.msk.f32.vlgmr.msra.gmra.mxu1 %vm3197_vm3, %v1430_v20  ;;  %v1404_v26 = vmul.f32 %v2203_v23, %v3096_v6  ;;  %v1201_v15 = vshrl.u32 %v1185_v21, 16  ;;  %v1216_v57 = vxor.u32 %v1200_v12, %v1184_v31  ;;  %v1188_v16 = vmul.u32 2221713035, %v1172_v54 }
 0x371   : > { %v1388_v7 = vpop.xlane.xlu1 %1387  ;;  %2135 = vmatprep.mubr.msk.f32.mxu1 %vm3203_vm4, %v1431_v24  ;;  %v1406_v4 = vmul.f32 %v2205_v48, %v3098_v53  ;;  %v1203_v20 = vshrl.u32 %v1187_v36, 16  ;;  %vm1246_vm11 = vcmp.ge.s32.totalorder %v1230_v63, 429496729  ;;  %v1218_v24 = vxor.u32 %v1202_v58, %v1186_v35 }
 0x372   : > { %2218 = vrcp.f32 %v1388_v7  ;;  %v1390_v19 = vpop.xlane.xlu0 %1389  ;;  %v1432_v43 = vmul.f32 1.25, %v1404_v26  ;;  %v1217_v59 = vxor.u32 %v1201_v15, %v1185_v21  ;;  %v1232_v23 = vshrl.u32 %v1216_v57, 1 }
 0x373   : > { %v2207_v6 = vpop.eup %2206  ;;  %2220 = vrcp.f32 %v1390_v19  ;;  %v1433_v34 = vmul.f32 1.25, %v1406_v4  ;;  %v1204_v22 = vshrl.u32 %v1188_v16, 16  ;;  %v1219_v26 = vxor.u32 %v1203_v20, %v1187_v36 }
 0x374   : > { %v2209_v27 = vpop.eup %2208  ;;  %2136 = vmatmul.mubr.msk.f32.gmra.mxu1 %vm3218_vm5, %v1432_v43  ;;  %v1408_v53 = vmul.f32 %v2207_v6, %v3104_v5  ;;  %v1233_v48 = vshrl.u32 %v1217_v59, 1  ;;  %vm1248_vm13 = vcmp.ge.s32.totalorder %v1232_v23, 429496729  ;;  %v1234_v4 = vshrl.u32 %v1218_v24, 1 }
 0x375   : > { %v1392_v33 = vpop.xlane.xlu1 %1391  ;;  %2138 = vmatprep.mubr.msk.f32.mxu1 %vm3225_vm6, %v1433_v34  ;;  %v1410_v10 = vmul.f32 %v2209_v27, %v3106_v46  ;;  %v1220_v31 = vxor.u32 %v1204_v22, %v1188_v16  ;;  %v1235_v2 = vshrl.u32 %v1219_v26, 1 }
 0x376   : > { %2222 = vrcp.f32 %v1392_v33  ;;  %v1394_v47 = vpop.xlane.xlu0 %1393  ;;  %v1434_v56 = vmul.f32 1.25, %v1408_v53  ;;  %vm1249_vm14 = vcmp.ge.s32.totalorder %v1233_v48, 429496729  ;;  %vm1250_vm15 = vcmp.ge.s32.totalorder %v1234_v4, 429496729 }
 0x377   : > { %v2211_v42 = vpop.eup %2210  ;;  %2224 = vrcp.f32 %v1394_v47  ;;  %v1435_v5 = vmul.f32 1.25, %v1410_v10  ;;  %v1236_v14 = vshrl.u32 %v1220_v31, 1  ;;  %vm1251_vm1 = vcmp.ge.s32.totalorder %v1235_v2, 429496729 }
 0x378   : > { %v2213_v39 = vpop.eup %2212  ;;  %2139 = vmatmul.mubr.msk.f32.gmra.mxu1 %vm3242_vm7, %v1434_v56  ;;  %v1412_v46 = vmul.f32 %v2211_v42, %v3111_v3 }
 0x379   : > { %v1396_v55 = vpop.xlane.xlu1 %1395  ;;  %2141 = vmatprep.mubr.msk.f32.mxu1 %vm3254_vm8, %v1435_v5  ;;  %v1414_v13 = vmul.f32 %v2213_v39, %v3113_v17  ;;  %vm1252_vm2 = vcmp.ge.s32.totalorder %v1236_v14, 429496729 }
 0x37a   : > { %2226 = vrcp.f32 %v1396_v55  ;;  %v1436_v9 = vmul.f32 1.25, %v1412_v46 }
 0x37b   : > { %v2215_v3 = vpop.eup %2214  ;;  %v1437_v11 = vmul.f32 1.25, %v1414_v13 }
 0x37c   : > { %v2217_v45 = vpop.eup %2216  ;;  %2142 = vmatmul.mubr.msk.f32.gmra.mxu1 %vm3264_vm9, %v1436_v9  ;;  %v1416_v44 = vmul.f32 %v2215_v3, %v3117_v40 }
 0x37d   : > { %2144 = vmatprep.mubr.msk.f32.mxu1 %vm3271_vm10, %v1437_v11  ;;  %v1418_v17 = vmul.f32 %v2217_v45, %v3119_v41 }
 0x37e   : > { %v1438_v61 = vmul.f32 1.25, %v1416_v44 }
 0x37f   : > { %v2219_v29 = vpop.eup %2218  ;;  %v1439_v32 = vmul.f32 1.25, %v1418_v17 }
 0x380   : > { %v2221_v0 = vpop.eup %2220  ;;  %2145 = vmatmul.mubr.msk.f32.gmra.mxu1 %vm1246_vm11, %v1438_v61  ;;  %v1420_v7 = vmul.f32 %v2219_v29, %v3123_v25 }
 0x381   : > { %2147 = vmatprep.mubr.msk.f32.mxu1 %vm1247_vm12, %v1439_v32  ;;  %v1422_v40 = vmul.f32 %v2221_v0, %v3125_v1 }
 0x382   : > { %v1440_v41 = vmul.f32 1.25, %v1420_v7 }
 0x383   : > { %v2223_v18 = vpop.eup %2222  ;;  %v1441_v19 = vmul.f32 1.25, %v1422_v40 }
 0x384   : > { %v2225_v43 = vpop.eup %2224  ;;  %2148 = vmatmul.mubr.msk.f32.gmra.mxu1 %vm1248_vm13, %v1440_v41  ;;  %v1424_v21 = vmul.f32 %v2223_v18, %v3129_v52 }
 0x385   : > { %2150 = vmatprep.mubr.msk.f32.mxu1 %vm1249_vm14, %v1441_v19  ;;  %v1426_v25 = vmul.f32 %v2225_v43, %v3131_v62 }
 0x386   : > { %v1442_v6 = vmul.f32 1.25, %v1424_v21 }
 0x387   : > { %v2227_v1 = vpop.eup %2226  ;;  %v1443_v34 = vmul.f32 1.25, %v1426_v25 }
 0x388   : > { %2151 = vmatmul.mubr.msk.f32.gmra.mxu1 %vm1250_vm15, %v1442_v6  ;;  %v1428_v60 = vmul.f32 %v2227_v1, %v3135_v51 }
 0x389   : > { %2153 = vmatprep.mubr.msk.f32.mxu1 %vm1251_vm1, %v1443_v34 }
 0x38a   : > { %v1444_v8 = vmul.f32 1.25, %v1428_v60 }
 0x38c   : > { %2154 = vmatmul.mubr.msk.f32.gmra.mxu1 %vm1252_vm2, %v1444_v8 }
 0x430   : > { %v2134_v52 = vpop.f32.mrf.mxu1 }
 0x431   : > { %1607 = vst.msk [vmem:[%s3293_s18 + $0x8] sm:$0xff] %vm763_vm0, %v2134_v52 }
 0x432   : > { %v1527_v62 = vpop.f32.mrf.mxu1 }
 0x433   : > { %1606 = vst.msk [vmem:[%s3293_s18] sm:$0xff] %vm763_vm0, %v1527_v62 }
 0x434   : > { %v2137_v51 = vpop.f32.mrf.mxu1 }
 0x435   : > { %1609 = vst.msk [vmem:[%s3293_s18 + $0x18] sm:$0xff] %vm763_vm0, %v2137_v51 }
 0x436   : > { %v1537_v27 = vpop.f32.mrf.mxu1 }
 0x437   : > { %1608 = vst.msk [vmem:[%s3293_s18 + $0x10] sm:$0xff] %vm763_vm0, %v1537_v27 }
 0x438   : > { %v2140_v53 = vpop.f32.mrf.mxu1 }
 0x439   : > { %1611 = vst.msk [vmem:[%s3293_s18 + $0x28] sm:$0xff] %vm763_vm0, %v2140_v53 }
 0x43a   : > { %v1547_v50 = vpop.f32.mrf.mxu1 }
 0x43b   : > { %1610 = vst.msk [vmem:[%s3293_s18 + $0x20] sm:$0xff] %vm763_vm0, %v1547_v50 }
 0x43c   : > { %v2143_v28 = vpop.f32.mrf.mxu1 }
 0x43d   : > { %1613 = vst.msk [vmem:[%s3293_s18 + $0x38] sm:$0xff] %vm763_vm0, %v2143_v28 }
 0x43e   : > { %v1557_v30 = vpop.f32.mrf.mxu1 }
 0x43f   : > { %1612 = vst.msk [vmem:[%s3293_s18 + $0x30] sm:$0xff] %vm763_vm0, %v1557_v30 }
 0x440   : > { %v2146_v33 = vpop.f32.mrf.mxu1 }
 0x441   : > { %1615 = vst.msk [vmem:[%s3293_s18 + $0x48] sm:$0xff] %vm763_vm0, %v2146_v33 }
 0x442   : > { %v1567_v10 = vpop.f32.mrf.mxu1 }
 0x443   : > { %1614 = vst.msk [vmem:[%s3293_s18 + $0x40] sm:$0xff] %vm763_vm0, %v1567_v10 }
 0x444   : > { %v2149_v12 = vpop.f32.mrf.mxu1 }
 0x445   : > { %1617 = vst.msk [vmem:[%s3293_s18 + $0x58] sm:$0xff] %vm763_vm0, %v2149_v12 }
 0x446   : > { %v1577_v35 = vpop.f32.mrf.mxu1 }
 0x447   : > { %1616 = vst.msk [vmem:[%s3293_s18 + $0x50] sm:$0xff] %vm763_vm0, %v1577_v35 }
 0x448   : > { %v2152_v54 = vpop.f32.mrf.mxu1 }
 0x449   : > { %1619 = vst.msk [vmem:[%s3293_s18 + $0x68] sm:$0xff] %vm763_vm0, %v2152_v54 }
 0x44a   : > { %v1587_v47 = vpop.f32.mrf.mxu1 }
 0x44b   : > { %1618 = vst.msk [vmem:[%s3293_s18 + $0x60] sm:$0xff] %vm763_vm0, %v1587_v47 }
 0x44c   : > { %v2155_v56 = vpop.f32.mrf.mxu1 }
 0x44d   : > { %1621 = vst.msk [vmem:[%s3293_s18 + $0x78] sm:$0xff] %vm763_vm0, %v2155_v56 }
 0x44e   : > { %v1597_v15 = vpop.f32.mrf.mxu1 }
 0x44f   : > { %1620 = vst.msk [vmem:[%s3293_s18 + $0x70] sm:$0xff] %vm763_vm0, %v1597_v15 }
 0x450 PF: > { %s16_s20 = sadd.s32 1, %s2234_s20  }
 0x451   : > { %p13_p4 = scmp.ge.s32.totalorder %s16_s20, 4  }
 0x453   :  { %15 = sbr.rel (!%p13_p4) target bundleno = 2 (0x2), region = 66 }

</bundles_post_ra>
